<compile_context>
chip_gen: v7x
topology: tpu7x:2x2x1
jax: 0.10.0
libtpu: 0.0.40
codegen_flags: <defaults>
</compile_context>

<pallas_src>
import functools
import math

import jax
import jax.numpy as jnp
from jax import lax
from jax.experimental import pallas as pl
from jax.experimental.pallas import tpu as pltpu

# --- Module hyper-parameters (defaults of BayesianLinear.__init__) ---
PI = 0.5
SIGMA1 = math.exp(-0.0)   # exp(sigma1), sigma1 = -0
SIGMA2 = math.exp(-6.0)   # exp(sigma2), sigma2 = -6
LOG_SQRT_2PI = math.log(math.sqrt(2.0 * math.pi))

# Trace-time folded constants for the scale-mixture prior:
#   p(v)     = A1*exp(-K1*v^2) + A2*exp(-K2*v^2)
#   log p(v) = log(A1) - K1*v^2 + log1p((A2/A1)*exp(-(K2-K1)*v^2))
C1 = 1.0 / (SIGMA1 * math.sqrt(2.0 * math.pi))
C2 = 1.0 / (SIGMA2 * math.sqrt(2.0 * math.pi))
K1 = 1.0 / (2.0 * SIGMA1 * SIGMA1)
K2 = 1.0 / (2.0 * SIGMA2 * SIGMA2)
A1 = PI * C1
A2 = (1.0 - PI) * C2
LOG_A1 = math.log(A1)
MIX_RATIO = A2 / A1
DELTA_K = K2 - K1


def _stable_softplus(x):
    return jnp.maximum(x, 0.0) + jnp.log1p(jnp.exp(-jnp.abs(x)))


def _prior_log_prob(v):
    # 1 exp + 1 log1p per element (vs 2 exp + 1 log for the naive mixture);
    # also robust to underflow of the narrow-sigma component.
    v2 = v * v
    return LOG_A1 - K1 * v2 + jnp.log1p(MIX_RATIO * jnp.exp(-DELTA_K * v2))


def bayesian_linear_kernel(x_ref, wmu_ref, wrho_ref, weps_ref,
                           bmu_ref, brho_ref, beps_ref,
                           y_ref, lp_ref, lvp_ref,
                           w_scratch, b_scratch,
                           *, out_features, tile_o, masked):
    o = pl.program_id(0)   # out_features tile   (parallel axis)
    b = pl.program_id(1)   # batch tile          (arbitrary, inner axis)

    # Sample this out_features tile once (first batch tile), cache the sampled
    # weights/bias in VMEM scratch for all batch tiles, and emit the per-tile
    # log-prob partial sums (no cross-step carry -> o axis can be "parallel").
    @pl.when(b == 0)
    def _sample_and_reduce():
        wrho = wrho_ref[...]
        wsigma = _stable_softplus(wrho)
        weps = weps_ref[...]
        w = wmu_ref[...] + wsigma * weps                 # (tile_o, in_features)
        w_scratch[...] = w

        brho = brho_ref[...]
        bsigma = _stable_softplus(brho)
        beps = beps_ref[...]
        bias = bmu_ref[...] + bsigma * beps              # (1, tile_o)
        b_scratch[...] = bias

        # log q(w|theta): Gaussian.log_prob with w = mu + sigma*eps
        #   -log(sqrt(2pi)) - log(sigma) - 0.5*eps^2   (single fused pass)
        w_post = jnp.log(wsigma) + 0.5 * (weps * weps) + LOG_SQRT_2PI
        b_post = jnp.log(bsigma) + 0.5 * (beps * beps) + LOG_SQRT_2PI
        w_prior = _prior_log_prob(w)
        b_prior = _prior_log_prob(bias)

        if masked:  # static flag: out_features zero-padded to the tile grid
            rows = o * tile_o + lax.broadcasted_iota(jnp.int32, (tile_o, 1), 0)
            wmask = (rows < out_features).astype(jnp.float32)
            cols = o * tile_o + lax.broadcasted_iota(jnp.int32, (1, tile_o), 1)
            bmask = (cols < out_features).astype(jnp.float32)
            w_post, w_prior = wmask * w_post, wmask * w_prior
            b_post, b_prior = bmask * b_post, bmask * b_prior

        lvp = -(jnp.sum(w_post) + jnp.sum(b_post))
        lp = jnp.sum(w_prior) + jnp.sum(b_prior)

        # Lane-dense (8,128) broadcast stores (unmasked vst); the tiny
        # num_tiles-length reduction finishes in plain JAX outside the kernel.
        lp_ref[...] = jnp.broadcast_to(lp, lp_ref.shape)
        lvp_ref[...] = jnp.broadcast_to(lvp, lvp_ref.shape)

    # F.linear: y = x @ W^T + b, contracting over the shared in_features axis.
    # Default f32 MXU precision; tolerance documented in the test below.
    y = lax.dot_general(
        x_ref[...], w_scratch[...],
        dimension_numbers=(((1,), (1,)), ((), ())),
        preferred_element_type=jnp.float32)
    y_ref[...] = y + b_scratch[...]


# ---------------------------------------------------------------------------
# Tile planning (generation-aware VMEM budget).
# ---------------------------------------------------------------------------
def _round_up(x, m):
    return (x + m - 1) // m * m


def _vmem_budget_bytes():
    cap = 64 << 20
    try:
        cap = int(getattr(pltpu.get_tpu_info(), "vmem_capacity_bytes", cap))
    except Exception:
        pass
    # 3/4 of physical VMEM (v5e/v6e 128 MiB, v7x 64 MiB), never plan > 64 MiB;
    # leaves headroom for compiler-internal scratch.
    return int(min((cap * 3) // 4, 64 << 20))


def _plan_bytes(tile_b, tile_o, in_f):
    f32 = 4
    w_io = 3 * 2 * tile_o * in_f * f32            # mu/rho/eps, double-buffered
    x_io = 2 * tile_b * in_f * f32                # x block, double-buffered
    y_io = 2 * tile_b * tile_o * f32              # y block, double-buffered
    bias_io = 3 * 2 * 8 * tile_o * f32            # (1,tile_o) pads to 8 sublanes
    part_io = 2 * 2 * 8 * 128 * f32               # partial-sum output blocks
    scratch = (tile_o * in_f + 8 * tile_o) * f32  # sampled w / bias scratch
    temps = 4 * tile_o * in_f * f32               # wsigma/w/eps/prior live temps
    return w_io + x_io + y_io + bias_io + part_io + scratch + temps


def _pick_tile_o(in_f, out_f, tile_b, budget):
    out_min = _round_up(out_f, 128)   # lane-dense output stores (>=128 wide)
    for t in (1024, 512, 256, 128):
        t_eff = min(t, out_min)
        if _plan_bytes(tile_b, t_eff, in_f) <= budget:
            return t_eff
    # TODO(synk): extremely large in_features would need an in_features grid
    # axis (K tiling); not implemented — fall back to the narrowest lane-dense tile.
    return 128


def bayesian_linear(x, weight_mu, weight_rho, weight_eps,
                    bias_mu, bias_rho, bias_eps,
                    *, tile_o=None, tile_b=None):
    """Pallas forward of BayesianLinear (sample=True, calculate_log_probs=True).

    Returns (y, log_prior, log_variational_posterior).
    """
    B, in_f = x.shape
    out_f = weight_mu.shape[0]

    budget = _vmem_budget_bytes()

    # Batch tiling: single full-batch tile for modest B, 256-row tiles otherwise.
    if tile_b is None:
        tile_b = B if B <= 512 else 256
    if tile_b != B:
        assert tile_b % 8 == 0, "batch tile must be a multiple of 8"
    b_pad = B if tile_b == B else _round_up(B, tile_b)

    if tile_o is None:
        tile_o = _pick_tile_o(in_f, out_f, tile_b, budget)
    assert tile_o % 128 == 0, "out_features tile must be lane-dense (mult of 128)"
    out_pad = _round_up(out_f, tile_o)

    num_o = out_pad // tile_o
    num_b = b_pad // tile_b
    masked = out_pad != out_f

    # Zero-pad to the tile grid (padded log-prob terms are masked in-kernel;
    # padded rows/cols of y are sliced off below; zero padding keeps all
    # transcendentals finite so masking cannot produce NaN).
    x_p = x if b_pad == B else jnp.pad(x, ((0, b_pad - B), (0, 0)))
    pad_w = (lambda a: a) if not masked else (
        lambda a: jnp.pad(a, ((0, out_pad - out_f), (0, 0))))
    pad_b = (lambda a: a.reshape(1, out_f)) if not masked else (
        lambda a: jnp.pad(a.reshape(1, out_f), ((0, 0), (0, out_pad - out_f))))
    wmu_p, wrho_p, weps_p = pad_w(weight_mu), pad_w(weight_rho), pad_w(weight_eps)
    bmu_p, brho_p, beps_p = pad_b(bias_mu), pad_b(bias_rho), pad_b(bias_eps)

    x_spec = pl.BlockSpec((tile_b, in_f), lambda o, b: (b, 0))
    w_spec = pl.BlockSpec((tile_o, in_f), lambda o, b: (o, 0))
    b_spec = pl.BlockSpec((1, tile_o), lambda o, b: (0, o))
    y_spec = pl.BlockSpec((tile_b, tile_o), lambda o, b: (b, o))
    part_spec = pl.BlockSpec((8, 128), lambda o, b: (o, 0))

    kernel = functools.partial(bayesian_linear_kernel,
                               out_features=out_f, tile_o=tile_o, masked=masked)

    y_p, lp_part, lvp_part = pl.pallas_call(
        kernel,
        out_shape=(
            jax.ShapeDtypeStruct((b_pad, out_pad), jnp.float32),
            jax.ShapeDtypeStruct((num_o * 8, 128), jnp.float32),
            jax.ShapeDtypeStruct((num_o * 8, 128), jnp.float32),
        ),
        grid_spec=pltpu.PrefetchScalarGridSpec(
            num_scalar_prefetch=0,
            grid=(num_o, num_b),
            in_specs=[x_spec, w_spec, w_spec, w_spec, b_spec, b_spec, b_spec],
            out_specs=(y_spec, part_spec, part_spec),
            scratch_shapes=[pltpu.VMEM((tile_o, in_f), jnp.float32),
                            pltpu.VMEM((1, tile_o), jnp.float32)],
        ),
        compiler_params=pltpu.CompilerParams(
            # o axis has no cross-step carry -> parallel (v7x megacore);
            # b axis revisits the partial-sum output blocks -> arbitrary.
            dimension_semantics=("parallel", "arbitrary"),
            vmem_limit_bytes=budget),
    )(x_p, wmu_p, wrho_p, weps_p, bmu_p, brho_p, beps_p)

    y = y_p[:B, :out_f]
    log_prior = jnp.sum(lp_part.reshape(num_o, 8, 128)[:, 0, 0])
    log_var_post = jnp.sum(lvp_part.reshape(num_o, 8, 128)[:, 0, 0])
    return y, log_prior, log_var_post


# ---------------------------------------------------------------------------
# Plain-JAX reference (mirrors the PyTorch forward, training / sample branch).
# ---------------------------------------------------------------------------
def _gaussian_log_prob(val, mu, sigma):
    return -LOG_SQRT_2PI - jnp.log(sigma) - (val - mu) ** 2 / (2.0 * sigma ** 2)


def _scale_mixture_log_prob(val):
    lp1 = -jnp.log(SIGMA1 * jnp.sqrt(2.0 * jnp.pi)) - val ** 2 / (2.0 * SIGMA1 ** 2)
    lp2 = -jnp.log(SIGMA2 * jnp.sqrt(2.0 * jnp.pi)) - val ** 2 / (2.0 * SIGMA2 ** 2)
    return jnp.log(PI * jnp.exp(lp1) + (1.0 - PI) * jnp.exp(lp2))


def reference_forward(x, weight_mu, weight_rho, weight_eps,
                      bias_mu, bias_rho, bias_eps):
    wsigma = jnp.log1p(jnp.exp(weight_rho))
    w = weight_mu + wsigma * weight_eps
    bsigma = jnp.log1p(jnp.exp(bias_rho))
    b = bias_mu + bsigma * bias_eps
    y = x @ w.T + b
    lvp = (jnp.sum(_gaussian_log_prob(w, weight_mu, wsigma))
           + jnp.sum(_gaussian_log_prob(b, bias_mu, bsigma)))
    lp = jnp.sum(_scale_mixture_log_prob(w)) + jnp.sum(_scale_mixture_log_prob(b))
    return y, lp, lvp


if __name__ == "__main__":
    def run_case(batch, in_features, out_features, key, **tile_kwargs):
        keys = jax.random.split(key, 7)
        x = jax.random.normal(keys[0], (batch, in_features), dtype=jnp.float32)
        weight_mu = jax.random.uniform(keys[1], (out_features, in_features),
                                       minval=-0.2, maxval=0.2, dtype=jnp.float32)
        weight_rho = jax.random.uniform(keys[2], (out_features, in_features),
                                        minval=-5.0, maxval=-4.0, dtype=jnp.float32)
        # Reparameterization noise (epsilon ~ N(0,1)) generated host-side.
        weight_eps = jax.random.normal(keys[3], (out_features, in_features),
                                       dtype=jnp.float32)
        bias_mu = jax.random.uniform(keys[4], (out_features,),
                                     minval=-0.2, maxval=0.2, dtype=jnp.float32)
        bias_rho = jax.random.uniform(keys[5], (out_features,),
                                      minval=-5.0, maxval=-4.0, dtype=jnp.float32)
        bias_eps = jax.random.normal(keys[6], (out_features,), dtype=jnp.float32)

        y, lp, lvp = bayesian_linear(x, weight_mu, weight_rho, weight_eps,
                                     bias_mu, bias_rho, bias_eps, **tile_kwargs)
        jax.block_until_ready((y, lp, lvp))

        y_ref, lp_ref, lvp_ref = reference_forward(
            x, weight_mu, weight_rho, weight_eps, bias_mu, bias_rho, bias_eps)

        assert y.shape == (batch, out_features)
        assert jnp.allclose(y, y_ref, atol=1e-4, rtol=1e-4), "y mismatch"
        assert jnp.allclose(lp, lp_ref, atol=1e-2, rtol=1e-4), "log_prior mismatch"
        assert jnp.allclose(lvp, lvp_ref, atol=1e-2, rtol=1e-4), \
            "log_variational_posterior mismatch"

    root = jax.random.PRNGKey(0)
    k1, k2 = jax.random.split(root)
    # Small layer, auto-picked tiles (single lane-dense tile, masked padding).
    run_case(batch=8, in_features=32, out_features=16, key=k1)
    # Multi-tile exercise: 2 out_features tiles (masked last tile) x 2 batch tiles.
    run_case(batch=16, in_features=64, out_features=200, key=k2,
             tile_o=128, tile_b=8)

    print("KERNEL_OK")
</pallas_src>

<mosaic_0001>
module attributes {stable_mosaic.version = 11 : i64} {
  func.func @bayesian_linear_kernel(%arg0: i32, %arg1: i32, %arg2: memref<8x32xf32, #tpu.memory_space<vmem>>, %arg3: memref<128x32xf32, #tpu.memory_space<vmem>>, %arg4: memref<128x32xf32, #tpu.memory_space<vmem>>, %arg5: memref<128x32xf32, #tpu.memory_space<vmem>>, %arg6: memref<1x128xf32, #tpu.memory_space<vmem>>, %arg7: memref<1x128xf32, #tpu.memory_space<vmem>>, %arg8: memref<1x128xf32, #tpu.memory_space<vmem>>, %arg9: memref<8x128xf32, #tpu.memory_space<vmem>>, %arg10: memref<8x128xf32, #tpu.memory_space<vmem>>, %arg11: memref<8x128xf32, #tpu.memory_space<vmem>>, %arg12: memref<128x32xf32, #tpu.memory_space<vmem>>, %arg13: memref<1x128xf32, #tpu.memory_space<vmem>>) attributes {dimension_semantics = [#tpu.dimension_semantics<parallel>, #tpu.dimension_semantics<arbitrary>], iteration_bounds = array<i64: 1, 1>, scalar_prefetch = 0 : i64, scratch_operands = 2 : i64, tpu.core_type = #tpu.core_type<tc>, window_params = [{transform_indices = @transform_0, window_bounds = array<i64: 8, 32>}, {transform_indices = @transform_1, window_bounds = array<i64: 128, 32>}, {transform_indices = @transform_2, window_bounds = array<i64: 128, 32>}, {transform_indices = @transform_3, window_bounds = array<i64: 128, 32>}, {transform_indices = @transform_4, window_bounds = array<i64: 1, 128>}, {transform_indices = @transform_5, window_bounds = array<i64: 1, 128>}, {transform_indices = @transform_6, window_bounds = array<i64: 1, 128>}, {transform_indices = @transform_7, window_bounds = array<i64: 8, 128>}, {transform_indices = @transform_8, window_bounds = array<i64: 8, 128>}, {transform_indices = @transform_9, window_bounds = array<i64: 8, 128>}]} {
    %c0_i32 = arith.constant 0 : i32
    %0 = arith.cmpi eq, %arg1, %c0_i32 : i32
    %1 = arith.extui %0 : i1 to i32
    %c0_i32_0 = arith.constant 0 : i32
    %2 = arith.cmpi ne, %1, %c0_i32_0 : i32
    scf.if %2 {
      %c0_8 = arith.constant 0 : index
      %c0_9 = arith.constant 0 : index
      %10 = vector.load %arg4[%c0_8, %c0_9] : memref<128x32xf32, #tpu.memory_space<vmem>>, vector<128x32xf32>
      %cst_10 = arith.constant 0.000000e+00 : f32
      %11 = vector.broadcast %cst_10 : f32 to vector<128x32xf32>
      %12 = arith.maximumf %10, %11 : vector<128x32xf32>
      %13 = math.absf %10 : vector<128x32xf32>
      %cst_11 = arith.constant 0.000000e+00 : f32
      %14 = vector.broadcast %cst_11 : f32 to vector<128x32xf32>
      %15 = arith.subf %14, %13 : vector<128x32xf32>
      %16 = math.exp %15 : vector<128x32xf32>
      %17 = math.log1p %16 : vector<128x32xf32>
      %18 = arith.addf %12, %17 : vector<128x32xf32>
      %c0_12 = arith.constant 0 : index
      %c0_13 = arith.constant 0 : index
      %19 = vector.load %arg5[%c0_12, %c0_13] : memref<128x32xf32, #tpu.memory_space<vmem>>, vector<128x32xf32>
      %c0_14 = arith.constant 0 : index
      %c0_15 = arith.constant 0 : index
      %20 = vector.load %arg3[%c0_14, %c0_15] : memref<128x32xf32, #tpu.memory_space<vmem>>, vector<128x32xf32>
      %21 = arith.mulf %18, %19 : vector<128x32xf32>
      %22 = arith.addf %20, %21 : vector<128x32xf32>
      %c0_16 = arith.constant 0 : index
      %c0_17 = arith.constant 0 : index
      %23 = vector.load %arg12[%c0_16, %c0_17] : memref<128x32xf32, #tpu.memory_space<vmem>>, vector<128x32xf32>
      tpu.vector_store %arg12[%c0_16, %c0_17], %22 {strides = array<i32>} : memref<128x32xf32, #tpu.memory_space<vmem>>, vector<128x32xf32>,
      %c0_18 = arith.constant 0 : index
      %c0_19 = arith.constant 0 : index
      %24 = vector.load %arg7[%c0_18, %c0_19] : memref<1x128xf32, #tpu.memory_space<vmem>>, vector<1x128xf32>
      %cst_20 = arith.constant 0.000000e+00 : f32
      %25 = vector.broadcast %cst_20 : f32 to vector<1x128xf32>
      %26 = arith.maximumf %24, %25 : vector<1x128xf32>
      %27 = math.absf %24 : vector<1x128xf32>
      %cst_21 = arith.constant 0.000000e+00 : f32
      %28 = vector.broadcast %cst_21 : f32 to vector<1x128xf32>
      %29 = arith.subf %28, %27 : vector<1x128xf32>
      %30 = math.exp %29 : vector<1x128xf32>
      %31 = math.log1p %30 : vector<1x128xf32>
      %32 = arith.addf %26, %31 : vector<1x128xf32>
      %c0_22 = arith.constant 0 : index
      %c0_23 = arith.constant 0 : index
      %33 = vector.load %arg8[%c0_22, %c0_23] : memref<1x128xf32, #tpu.memory_space<vmem>>, vector<1x128xf32>
      %c0_24 = arith.constant 0 : index
      %c0_25 = arith.constant 0 : index
      %34 = vector.load %arg6[%c0_24, %c0_25] : memref<1x128xf32, #tpu.memory_space<vmem>>, vector<1x128xf32>
      %35 = arith.mulf %32, %33 : vector<1x128xf32>
      %36 = arith.addf %34, %35 : vector<1x128xf32>
      %c0_26 = arith.constant 0 : index
      %c0_27 = arith.constant 0 : index
      %37 = vector.load %arg13[%c0_26, %c0_27] : memref<1x128xf32, #tpu.memory_space<vmem>>, vector<1x128xf32>
      tpu.vector_store %arg13[%c0_26, %c0_27], %36 {strides = array<i32>} : memref<1x128xf32, #tpu.memory_space<vmem>>, vector<1x128xf32>,
      %38 = math.log %18 : vector<128x32xf32>
      %39 = arith.mulf %19, %19 : vector<128x32xf32>
      %cst_28 = arith.constant 5.000000e-01 : f32
      %40 = vector.broadcast %cst_28 : f32 to vector<128x32xf32>
      %41 = arith.mulf %40, %39 : vector<128x32xf32>
      %42 = arith.addf %38, %41 : vector<128x32xf32>
      %cst_29 = arith.constant 0.918938517 : f32
      %43 = vector.broadcast %cst_29 : f32 to vector<128x32xf32>
      %44 = arith.addf %42, %43 : vector<128x32xf32>
      %45 = math.log %32 : vector<1x128xf32>
      %46 = arith.mulf %33, %33 : vector<1x128xf32>
      %cst_30 = arith.constant 5.000000e-01 : f32
      %47 = vector.broadcast %cst_30 : f32 to vector<1x128xf32>
      %48 = arith.mulf %47, %46 : vector<1x128xf32>
      %49 = arith.addf %45, %48 : vector<1x128xf32>
      %cst_31 = arith.constant 0.918938517 : f32
      %50 = vector.broadcast %cst_31 : f32 to vector<1x128xf32>
      %51 = arith.addf %49, %50 : vector<1x128xf32>
      %52 = arith.mulf %22, %22 : vector<128x32xf32>
      %cst_32 = arith.constant 5.000000e-01 : f32
      %53 = vector.broadcast %cst_32 : f32 to vector<128x32xf32>
      %54 = arith.mulf %53, %52 : vector<128x32xf32>
      %cst_33 = arith.constant -1.6120857 : f32
      %55 = vector.broadcast %cst_33 : f32 to vector<128x32xf32>
      %56 = arith.subf %55, %54 : vector<128x32xf32>
      %cst_34 = arith.constant -81376.8984 : f32
      %57 = vector.broadcast %cst_34 : f32 to vector<128x32xf32>
      %58 = arith.mulf %57, %52 : vector<128x32xf32>
      %59 = math.exp %58 : vector<128x32xf32>
      %cst_35 = arith.constant 403.428802 : f32
      %60 = vector.broadcast %cst_35 : f32 to vector<128x32xf32>
      %61 = arith.mulf %60, %59 : vector<128x32xf32>
      %62 = math.log1p %61 : vector<128x32xf32>
      %63 = arith.addf %56, %62 : vector<128x32xf32>
      %64 = arith.mulf %36, %36 : vector<1x128xf32>
      %cst_36 = arith.constant 5.000000e-01 : f32
      %65 = vector.broadcast %cst_36 : f32 to vector<1x128xf32>
      %66 = arith.mulf %65, %64 : vector<1x128xf32>
      %cst_37 = arith.constant -1.6120857 : f32
      %67 = vector.broadcast %cst_37 : f32 to vector<1x128xf32>
      %68 = arith.subf %67, %66 : vector<1x128xf32>
      %cst_38 = arith.constant -81376.8984 : f32
      %69 = vector.broadcast %cst_38 : f32 to vector<1x128xf32>
      %70 = arith.mulf %69, %64 : vector<1x128xf32>
      %71 = math.exp %70 : vector<1x128xf32>
      %cst_39 = arith.constant 403.428802 : f32
      %72 = vector.broadcast %cst_39 : f32 to vector<1x128xf32>
      %73 = arith.mulf %72, %71 : vector<1x128xf32>
      %74 = math.log1p %73 : vector<1x128xf32>
      %75 = arith.addf %68, %74 : vector<1x128xf32>
      %c128_i32 = arith.constant 128 : i32
      %76 = arith.muli %arg0, %c128_i32 : i32
      %77 = tpu.iota {dimensions = array<i32: 0>} : vector<128x1xi32>
      %78 = vector.broadcast %76 : i32 to vector<128x1xi32>
      %79 = arith.addi %78, %77 : vector<128x1xi32>
      %c16_i32 = arith.constant 16 : i32
      %80 = vector.broadcast %c16_i32 : i32 to vector<128x1xi32>
      %81 = arith.cmpi slt, %79, %80 : vector<128x1xi32>
      %82 = arith.extui %81 : vector<128x1xi1> to vector<128x1xi32>
      %83 = arith.sitofp %82 : vector<128x1xi32> to vector<128x1xf32>
      %c128_i32_40 = arith.constant 128 : i32
      %84 = arith.muli %arg0, %c128_i32_40 : i32
      %85 = tpu.iota {dimensions = array<i32: 1>} : vector<1x128xi32>
      %86 = vector.broadcast %84 : i32 to vector<1x128xi32>
      %87 = arith.addi %86, %85 : vector<1x128xi32>
      %c16_i32_41 = arith.constant 16 : i32
      %88 = vector.broadcast %c16_i32_41 : i32 to vector<1x128xi32>
      %89 = arith.cmpi slt, %87, %88 : vector<1x128xi32>
      %90 = arith.extui %89 : vector<1x128xi1> to vector<1x128xi32>
      %91 = arith.sitofp %90 : vector<1x128xi32> to vector<1x128xf32>
      %92 = vector.broadcast %83 : vector<128x1xf32> to vector<128x32xf32>
      %93 = arith.mulf %92, %44 : vector<128x32xf32>
      %94 = vector.broadcast %83 : vector<128x1xf32> to vector<128x32xf32>
      %95 = arith.mulf %94, %63 : vector<128x32xf32>
      %96 = arith.mulf %91, %51 : vector<1x128xf32>
      %97 = arith.mulf %91, %75 : vector<1x128xf32>
      %98 = vector.shape_cast %93 : vector<128x32xf32> to vector<1x128x32xf32>
      %cst_42 = arith.constant dense<0.000000e+00> : vector<1xf32>
      %99 = vector.multi_reduction <add>, %98, %cst_42 [1, 2] : vector<1x128x32xf32> to vector<1xf32>
      %100 = vector.shape_cast %99 : vector<1xf32> to vector<1x1x1xf32>
      %101 = vector.extract %100[0, 0, 0] : f32 from vector<1x1x1xf32>
      %102 = vector.shape_cast %96 : vector<1x128xf32> to vector<1x1x128xf32>
      %cst_43 = arith.constant dense<0.000000e+00> : vector<1xf32>
      %103 = vector.multi_reduction <add>, %102, %cst_43 [1, 2] : vector<1x1x128xf32> to vector<1xf32>
      %104 = vector.shape_cast %103 : vector<1xf32> to vector<1x1x1xf32>
      %105 = vector.extract %104[0, 0, 0] : f32 from vector<1x1x1xf32>
      %106 = arith.addf %101, %105 : f32
      %cst_44 = arith.constant 0.000000e+00 : f32
      %107 = arith.subf %cst_44, %106 : f32
      %108 = vector.shape_cast %95 : vector<128x32xf32> to vector<1x128x32xf32>
      %cst_45 = arith.constant dense<0.000000e+00> : vector<1xf32>
      %109 = vector.multi_reduction <add>, %108, %cst_45 [1, 2] : vector<1x128x32xf32> to vector<1xf32>
      %110 = vector.shape_cast %109 : vector<1xf32> to vector<1x1x1xf32>
      %111 = vector.extract %110[0, 0, 0] : f32 from vector<1x1x1xf32>
      %112 = vector.shape_cast %97 : vector<1x128xf32> to vector<1x1x128xf32>
      %cst_46 = arith.constant dense<0.000000e+00> : vector<1xf32>
      %113 = vector.multi_reduction <add>, %112, %cst_46 [1, 2] : vector<1x1x128xf32> to vector<1xf32>
      %114 = vector.shape_cast %113 : vector<1xf32> to vector<1x1x1xf32>
      %115 = vector.extract %114[0, 0, 0] : f32 from vector<1x1x1xf32>
      %116 = arith.addf %111, %115 : f32
      %117 = vector.broadcast %116 : f32 to vector<8x128xf32>
      %c0_47 = arith.constant 0 : index
      %c0_48 = arith.constant 0 : index
      %118 = vector.load %arg10[%c0_47, %c0_48] : memref<8x128xf32, #tpu.memory_space<vmem>>, vector<8x128xf32>
      tpu.vector_store %arg10[%c0_47, %c0_48], %117 {strides = array<i32>} : memref<8x128xf32, #tpu.memory_space<vmem>>, vector<8x128xf32>,
      %119 = vector.broadcast %107 : f32 to vector<8x128xf32>
      %c0_49 = arith.constant 0 : index
      %c0_50 = arith.constant 0 : index
      %120 = vector.load %arg11[%c0_49, %c0_50] : memref<8x128xf32, #tpu.memory_space<vmem>>, vector<8x128xf32>
      tpu.vector_store %arg11[%c0_49, %c0_50], %119 {strides = array<i32>} : memref<8x128xf32, #tpu.memory_space<vmem>>, vector<8x128xf32>,
    } else {
    }
    %c0 = arith.constant 0 : index
    %c0_1 = arith.constant 0 : index
    %3 = vector.load %arg2[%c0, %c0_1] : memref<8x32xf32, #tpu.memory_space<vmem>>, vector<8x32xf32>
    %c0_2 = arith.constant 0 : index
    %c0_3 = arith.constant 0 : index
    %4 = vector.load %arg12[%c0_2, %c0_3] : memref<128x32xf32, #tpu.memory_space<vmem>>, vector<128x32xf32>
    %cst = arith.constant dense<0.000000e+00> : vector<8x128xf32>
    %5 = tpu.matmul %3, %4, %cst {dimension_numbers = #tpu.dot_dimension_numbers<[1], [1], [0], [0], [0, 0, 1, 0], [], []>} : vector<8x32xf32>, vector<128x32xf32>, vector<8x128xf32> -> vector<8x128xf32>
    %c0_4 = arith.constant 0 : index
    %c0_5 = arith.constant 0 : index
    %6 = vector.load %arg13[%c0_4, %c0_5] : memref<1x128xf32, #tpu.memory_space<vmem>>, vector<1x128xf32>
    %7 = vector.broadcast %6 : vector<1x128xf32> to vector<8x128xf32>
    %8 = arith.addf %5, %7 : vector<8x128xf32>
    %c0_6 = arith.constant 0 : index
    %c0_7 = arith.constant 0 : index
    %9 = vector.load %arg9[%c0_6, %c0_7] : memref<8x128xf32, #tpu.memory_space<vmem>>, vector<8x128xf32>
    tpu.vector_store %arg9[%c0_6, %c0_7], %8 {strides = array<i32>} : memref<8x128xf32, #tpu.memory_space<vmem>>, vector<8x128xf32>,
    return
  }
  func.func @transform_0(%arg0: i32, %arg1: i32) -> (i32, i32) {
    %c0_i32 = arith.constant 0 : i32
    %c0_i32_0 = arith.constant 0 : i32
    return %arg1, %c0_i32 : i32, i32
  }
  func.func @transform_1(%arg0: i32, %arg1: i32) -> (i32, i32) {
    %c0_i32 = arith.constant 0 : i32
    %c0_i32_0 = arith.constant 0 : i32
    return %arg0, %c0_i32 : i32, i32
  }
  func.func @transform_2(%arg0: i32, %arg1: i32) -> (i32, i32) {
    %c0_i32 = arith.constant 0 : i32
    %c0_i32_0 = arith.constant 0 : i32
    return %arg0, %c0_i32 : i32, i32
  }
  func.func @transform_3(%arg0: i32, %arg1: i32) -> (i32, i32) {
    %c0_i32 = arith.constant 0 : i32
    %c0_i32_0 = arith.constant 0 : i32
    return %arg0, %c0_i32 : i32, i32
  }
  func.func @transform_4(%arg0: i32, %arg1: i32) -> (i32, i32) {
    %c0_i32 = arith.constant 0 : i32
    %c0_i32_0 = arith.constant 0 : i32
    return %c0_i32, %arg0 : i32, i32
  }
  func.func @transform_5(%arg0: i32, %arg1: i32) -> (i32, i32) {
    %c0_i32 = arith.constant 0 : i32
    %c0_i32_0 = arith.constant 0 : i32
    return %c0_i32, %arg0 : i32, i32
  }
  func.func @transform_6(%arg0: i32, %arg1: i32) -> (i32, i32) {
    %c0_i32 = arith.constant 0 : i32
    %c0_i32_0 = arith.constant 0 : i32
    return %c0_i32, %arg0 : i32, i32
  }
  func.func @transform_7(%arg0: i32, %arg1: i32) -> (i32, i32) {
    %c0_i32 = arith.constant 0 : i32
    return %arg1, %arg0 : i32, i32
  }
  func.func @transform_8(%arg0: i32, %arg1: i32) -> (i32, i32) {
    %c0_i32 = arith.constant 0 : i32
    %c0_i32_0 = arith.constant 0 : i32
    return %arg0, %c0_i32 : i32, i32
  }
  func.func @transform_9(%arg0: i32, %arg1: i32) -> (i32, i32) {
    %c0_i32 = arith.constant 0 : i32
    %c0_i32_0 = arith.constant 0 : i32
    return %arg0, %c0_i32 : i32, i32
  }
}

</mosaic_0001>

<bundles_post_ra>
// kernel: tpu_custom_call.1
= control target key start
LH: loop header
LB: loop body
LE: loop exit
PB: predicated region body
PF: predicated region fallthrough
CT: control target
= control target key end

     0   :  { %15 = vsyncpa [#allocation5], 0  ;;  %v1560_v2 = vmov 0.0|0.0   ;;  %vm355_vm4 = vcmask 261120   ;;  %s2712_s0 = inlined_call_operand.vmem [shape: f32[8,32], index: 0, kind: input, shape index: {}]   ;;  %s2713_s1 = inlined_call_operand.vmem [shape: f32[128,32], index: 1, kind: input, shape index: {}]   ;;  %s2714_s2 = inlined_call_operand.vmem [shape: f32[128,32], index: 2, kind: input, shape index: {}]   ;;  %s2715_s3 = inlined_call_operand.vmem [shape: f32[128,32], index: 3, kind: input, shape index: {}]   ;;  %s2716_s4 = inlined_call_operand.vmem [shape: f32[1,128], index: 4, kind: input, shape index: {}]   ;;  %s2717_s5 = inlined_call_operand.vmem [shape: f32[1,128], index: 5, kind: input, shape index: {}]   ;;  %s2718_s6 = inlined_call_operand.vmem [shape: f32[1,128], index: 6, kind: input, shape index: {}]   ;;  %s2719_s7 = inlined_call_operand.hbm [shape: f32[8,128], index: 7, kind: output, shape index: {0}]   ;;  %s2720_s8 = inlined_call_operand.hbm [shape: f32[8,128], index: 8, kind: output, shape index: {1}]   ;;  %s2721_s9 = inlined_call_operand.hbm [shape: f32[8,128], index: 9, kind: output, shape index: {2}]  }
   0x1   :  { %v1619_v0 = vld [vmem:[%s2714_s2] sm:$0xff]  ;;  %v1624_v1 = vld [vmem:[%s2714_s2 + $0x8] sm:$0xff]  ;;  %1274 = vmatprep.subr.bf16.mxu0 %v1560_v2  ;;  %v1632_v7 = vld [vmem:[%s2714_s2 + $0x10] sm:$0xff] }
   0x2   :  { %v67_v3 = vand.u32 2147483647, %v1619_v0  ;;  %v68_v4 = vand.u32 2147483647, %v1624_v1  ;;  %v1637_v8 = vld [vmem:[%s2714_s2 + $0x18] sm:$0xff]  ;;  %v1644_v15 = vld [vmem:[%s2714_s2 + $0x20] sm:$0xff] }
   0x3   :  { %v69_v9 = vand.u32 2147483647, %v1632_v7  ;;  %v70_v10 = vand.u32 2147483647, %v1637_v8  ;;  %v1649_v16 = vld [vmem:[%s2714_s2 + $0x28] sm:$0xff]  ;;  %v1656_v22 = vld [vmem:[%s2714_s2 + $0x30] sm:$0xff] }
   0x4   :  { %v83_v5 = vsub.f32 0.0, %v67_v3  ;;  %v84_v6 = vsub.f32 0.0, %v68_v4  ;;  %v71_v17 = vand.u32 2147483647, %v1644_v15  ;;  %v72_v20 = vand.u32 2147483647, %v1649_v16 }
   0x5   :  { %v85_v13 = vsub.f32 0.0, %v69_v9  ;;  %v86_v14 = vsub.f32 0.0, %v70_v10  ;;  %v1661_v24 = vld [vmem:[%s2714_s2 + $0x38] sm:$0xff]  ;;  %v73_v25 = vand.u32 2147483647, %v1656_v22  ;;  %v1668_v30 = vld [vmem:[%s2714_s2 + $0x40] sm:$0xff] }
   0x6   :  { %v99_v11 = vmul.f32 1.442695, %v83_v5  ;;  %v101_v12 = vmul.f32 1.442695, %v84_v6  ;;  %v87_v21 = vsub.f32 0.0, %v71_v17  ;;  %v88_v23 = vsub.f32 0.0, %v72_v20 }
   0x7   :  { %v103_v18 = vmul.f32 1.442695, %v85_v13  ;;  %v105_v19 = vmul.f32 1.442695, %v86_v14  ;;  %v74_v27 = vand.u32 2147483647, %v1661_v24 }
   0x8   :  { %1320 = vpow2.f32 %v99_v11  ;;  %v107_v26 = vmul.f32 1.442695, %v87_v21  ;;  %v109_v28 = vmul.f32 1.442695, %v88_v23  ;;  %v89_v29 = vsub.f32 0.0, %v73_v25  ;;  %v1673_v32 = vld [vmem:[%s2714_s2 + $0x48] sm:$0xff] }
   0x9   :  { %1322 = vpow2.f32 %v101_v12  ;;  %v90_v31 = vsub.f32 0.0, %v74_v27  ;;  %v75_v33 = vand.u32 2147483647, %v1668_v30  ;;  %v51_v34 = vmax.f32 %v1619_v0, 0.0  ;;  %v1683_v41 = vld [vmem:[%s2714_s2 + $0x50] sm:$0xff]  ;;  %v1692_v49 = vld [vmem:[%s2714_s2 + $0x58] sm:$0xff] }
   0xa   :  { %1324 = vpow2.f32 %v103_v18  ;;  %v111_v35 = vmul.f32 1.442695, %v89_v29  ;;  %v76_v36 = vand.u32 2147483647, %v1673_v32  ;;  %v52_v37 = vmax.f32 %v1624_v1, 0.0 }
   0xb   :  { %1326 = vpow2.f32 %v105_v19  ;;  %v53_v38 = vmax.f32 %v1632_v7, 0.0  ;;  %v113_v39 = vmul.f32 1.442695, %v90_v31  ;;  %v91_v40 = vsub.f32 0.0, %v75_v33 }
   0xc   :  { %1328 = vpow2.f32 %v107_v26  ;;  %v54_v42 = vmax.f32 %v1637_v8, 0.0  ;;  %v55_v43 = vmax.f32 %v1644_v15, 0.0  ;;  %v56_v44 = vmax.f32 %v1649_v16, 0.0 }
   0xd   :  { %1330 = vpow2.f32 %v109_v28  ;;  %v57_v46 = vmax.f32 %v1656_v22, 0.0  ;;  %v92_v47 = vsub.f32 0.0, %v76_v36  ;;  %v115_v48 = vmul.f32 1.442695, %v91_v40 }
   0xe   :  { %1332 = vpow2.f32 %v111_v35  ;;  %v77_v54 = vand.u32 2147483647, %v1683_v41  ;;  %v58_v57 = vmax.f32 %v1661_v24, 0.0  ;;  %v59_v60 = vmax.f32 %v1668_v30, 0.0 }
   0xf   :  { %1334 = vpow2.f32 %v113_v39  ;;  %v78_v61 = vand.u32 2147483647, %v1692_v49  ;;  %v117_v4 = vmul.f32 1.442695, %v92_v47 }
  0x10   :  { %1336 = vpow2.f32 %v115_v48  ;;  %v1702_v10 = vsub.f32 0.0, %v77_v54 }
  0x12   :  { %v1321_v45 = vpop.eup %1320 }
  0x13   :  { %v1323_v50 = vpop.eup %1322  ;;  %v131_v51 = vadd.f32 1.0, %v1321_v45  ;;  %v134_v52 = vmul.f32 -0.5, %v1321_v45  ;;  %v137_v53 = vand.u32 2147483647, %v1321_v45 }
  0x14   :  { %v140_v55 = vadd.f32 1.0, %v1323_v50  ;;  %v143_v56 = vmul.f32 -0.5, %v1323_v50  ;;  %v1325_v58 = vpop.eup %1324  ;;  %v146_v59 = vand.u32 2147483647, %v1323_v50 }
  0x15   :  { %1338 = vlog2.f32 %v131_v51  ;;  %v1327_v62 = vpop.eup %1326  ;;  %v135_v63 = vadd.f32 1.0, %v134_v52  ;;  %v149_v3 = vadd.f32 1.0, %v1325_v58  ;;  %vm1698_vm0 = vcmp.lt.f32.partialorder %v137_v53, 0.0004427343 }
  0x16   :  { %1340 = vlog2.f32 %v140_v55  ;;  %v152_v6 = vmul.f32 -0.5, %v1325_v58  ;;  %v158_v9 = vadd.f32 1.0, %v1327_v62  ;;  %v1329_v11 = vpop.eup %1328  ;;  %v144_v12 = vadd.f32 1.0, %v143_v56 }
  0x17   :  { %1342 = vlog2.f32 %v149_v3  ;;  %v155_v13 = vand.u32 2147483647, %v1325_v58  ;;  %v161_v14 = vmul.f32 -0.5, %v1327_v62  ;;  %v1331_v17 = vpop.eup %1330  ;;  %vm1704_vm1 = vcmp.lt.f32.partialorder %v146_v59, 0.0004427343 }
  0x18   :  { %1344 = vlog2.f32 %v158_v9  ;;  %v164_v19 = vand.u32 2147483647, %v1327_v62  ;;  %v167_v20 = vadd.f32 1.0, %v1329_v11  ;;  %v136_v21 = vmul.f32 %v1321_v45, %v135_v63  ;;  %v1333_v27 = vpop.eup %1332 }
  0x19   :  { %v153_v23 = vadd.f32 1.0, %v152_v6  ;;  %v162_v25 = vadd.f32 1.0, %v161_v14  ;;  %v170_v26 = vmul.f32 -0.5, %v1329_v11  ;;  %v173_v28 = vand.u32 2147483647, %v1329_v11  ;;  %v1708_v33 = vpop.eup %1334 }
  0x1a   :  { %1346 = vlog2.f32 %v167_v20  ;;  %v176_v29 = vadd.f32 1.0, %v1331_v17  ;;  %v179_v31 = vmul.f32 -0.5, %v1331_v17  ;;  %v145_v35 = vmul.f32 %v1323_v50, %v144_v12  ;;  %v1718_v51 = vpop.eup %1336 }
  0x1b   :  { %vm1710_vm2 = vcmp.lt.f32.partialorder %v155_v13, 0.0004427343  ;;  %v171_v39 = vadd.f32 1.0, %v170_v26  ;;  %v182_v40 = vand.u32 2147483647, %v1331_v17  ;;  %v185_v45 = vadd.f32 1.0, %v1333_v27 }
  0x1c   :  { %vm1714_vm3 = vcmp.lt.f32.partialorder %v164_v19, 0.0004427343  ;;  %1348 = vlog2.f32 %v176_v29  ;;  %v188_v48 = vmul.f32 -0.5, %v1333_v27  ;;  %v154_v52 = vmul.f32 %v1325_v58, %v153_v23 }
  0x1d   :  { %v180_v53 = vadd.f32 1.0, %v179_v31  ;;  %v191_v54 = vand.u32 2147483647, %v1333_v27  ;;  %v194_v50 = vadd.f32 1.0, %v1708_v33  ;;  %v163_v56 = vmul.f32 %v1327_v62, %v162_v25 }
  0x1e   :  { %v172_v59 = vmul.f32 %v1329_v11, %v171_v39  ;;  %vm1721_vm5 = vcmp.lt.f32.partialorder %v173_v28, 0.0004427343  ;;  %1350 = vlog2.f32 %v185_v45 }
  0x1f   :  { %v1339_v55 = vpop.eup %1338 }
  0x20   :  { %16 = vsyncpa [#allocation7], 0  ;;  %v1341_v3 = vpop.eup %1340  ;;  %v133_v6 = vmul.f32 0.6931472, %v1339_v55  ;;  %vm1725_vm6 = vcmp.lt.f32.partialorder %v182_v40, 0.0004427343  ;;  %1352 = vlog2.f32 %v194_v50  ;;  %v181_v20 = vmul.f32 %v1331_v17, %v180_v53 }
  0x21   :  { %v189_v58 = vadd.f32 1.0, %v188_v48  ;;  %v142_v12 = vmul.f32 0.6931472, %v1341_v3  ;;  %v197_v13 = vmul.f32 -0.5, %v1708_v33  ;;  %v200_v62 = vand.u32 2147483647, %v1708_v33  ;;  %v1343_v11 = vpop.eup %1342  ;;  %vm1927_vm10 = vmpackc.low %vm355_vm4, %vm355_vm4 }
  0x22   :  { %1354 = vpow2.f32 %v117_v4  ;;  %v139_v14 = vsel %vm1698_vm0, %v136_v21, %v133_v6  ;;  %v1736_v19 = vld [vmem:[%s2715_s3] sm:$0xff]  ;;  %vm1738_vm7 = vcmp.lt.f32.partialorder %v191_v54, 0.0004427343  ;;  %v203_v25 = vadd.f32 1.0, %v1718_v51  ;;  %v1345_v26 = vpop.eup %1344  ;;  %v1752_v21 = vld [vmem:[%s2715_s3 + $0x8] sm:$0xff]  ;;  %v309_v47 = vld [vmem:[%s2713_s1 + $0x10] sm:$0xff] }
  0x23   :  { %v148_v4 = vsel %vm1704_vm1, %v145_v35, %v142_v12  ;;  %v1747_v5 = vadd.f32 %v139_v14, %v51_v34  ;;  %v151_v17 = vmul.f32 0.6931472, %v1343_v11  ;;  %v206_v28 = vmul.f32 -0.5, %v1718_v51  ;;  %v307_v18 = vld [vmem:[%s2713_s1] sm:$0xff]  ;;  %v308_v35 = vld [vmem:[%s2713_s1 + $0x8] sm:$0xff]  ;;  %v310_v3 = vld [vmem:[%s2713_s1 + $0x18] sm:$0xff] }
  0x24   :  { %v1757_v29 = vadd.f32 %v148_v4, %v52_v37  ;;  %v160_v31 = vmul.f32 0.6931472, %v1345_v26  ;;  %v190_v0 = vmul.f32 %v1333_v27, %v189_v58  ;;  %1356 = vlog2.f32 %v203_v25  ;;  %v1347_v34 = vpop.eup %1346  ;;  %v1772_v37 = vld [vmem:[%s2715_s3 + $0x10] sm:$0xff]  ;;  %v1814_v58 = vld [vmem:[%s2715_s3 + $0x20] sm:$0xff]  ;;  %v1835_v25 = vld [vmem:[%s2715_s3 + $0x28] sm:$0xff] }
  0x25   :  { %v323_v39 = vmul.f32 %v1736_v19, %v1747_v5  ;;  %v157_v1 = vsel %vm1710_vm2, %v154_v52, %v151_v17  ;;  %v198_v40 = vadd.f32 1.0, %v197_v13  ;;  %vm1774_vm8 = vcmp.lt.f32.partialorder %v200_v62, 0.0004427343  ;;  %v1789_v52 = vld [vmem:[%s2715_s3 + $0x18] sm:$0xff]  ;;  %v311_v15 = vld [vmem:[%s2713_s1 + $0x20] sm:$0xff]  ;;  %v1861_v16 = vld [vmem:[%s2715_s3 + $0x30] sm:$0xff] }
  0x26   :  { %v324_v45 = vmul.f32 %v1752_v21, %v1757_v29  ;;  %v166_v48 = vsel %vm1714_vm3, %v163_v56, %v160_v31  ;;  %v1784_v36 = vadd.f32 %v157_v1, %v53_v38  ;;  %v169_v53 = vmul.f32 0.6931472, %v1347_v34  ;;  %v1349_v54 = vpop.eup %1348  ;;  %v1902_v24 = vld [vmem:[%s2714_s2 + $0x68] sm:$0xff] }
  0x27   :  { %v1791_v50 = vadd.f32 %v323_v39, %v307_v18  ;;  %v1795_v55 = vadd.f32 %v166_v48, %v54_v42  ;;  %v207_v7 = vadd.f32 1.0, %v206_v28  ;;  %v94_v38 = vsub.f32 0.0, %v78_v61  ;;  %v312_v28 = vld [vmem:[%s2713_s1 + $0x28] sm:$0xff] }
  0x28   :  { %v1802_v56 = vadd.f32 %v324_v45, %v308_v35  ;;  %v325_v6 = vmul.f32 %v1772_v37, %v1784_v36  ;;  %v175_v8 = vsel %vm1721_vm5, %v172_v59, %v169_v53  ;;  %v178_v42 = vmul.f32 0.6931472, %v1349_v54  ;;  %v1351_v12 = vpop.eup %1350  ;;  %v314_v45 = vld [vmem:[%s2713_s1 + $0x38] sm:$0xff] }
  0x29   :  { %356 = vst.msk [vmem:[#allocation2] sm:$0xff] %vm355_vm4, %v1791_v50  ;;  %v326_v61 = vmul.f32 %v1789_v52, %v1795_v55  ;;  %v1822_v13 = vadd.f32 %v175_v8, %v55_v43  ;;  %v199_v63 = vmul.f32 %v1708_v33, %v198_v40  ;;  %v209_v59 = vand.u32 2147483647, %v1718_v51  ;;  %v313_v40 = vld [vmem:[%s2713_s1 + $0x30] sm:$0xff] }
  0x2a   :  { %v1353_v62 = vpop.eup %1352  ;;  %357 = vst.msk [vmem:[#allocation2 + $0x8] sm:$0xff] %vm355_vm4, %v1802_v56  ;;  %v1828_v11 = vadd.f32 %v325_v6, %v309_v47  ;;  %v184_v14 = vsel %vm1725_vm6, %v181_v20, %v178_v42  ;;  %v187_v43 = vmul.f32 0.6931472, %v1351_v12  ;;  %v119_v33 = vmul.f32 1.442695, %v1702_v10 }
  0x2b   :  { %v1843_v4 = vadd.f32 %v326_v61, %v310_v3  ;;  %v1847_v9 = vadd.f32 %v184_v14, %v56_v44  ;;  %v327_v20 = vmul.f32 %v1814_v58, %v1822_v13  ;;  %v196_v17 = vmul.f32 0.6931472, %v1353_v62 }
  0x2c   :  { %v1841_v26 = vpop.eup %1354  ;;  %358 = vst.msk [vmem:[#allocation2 + $0x10] sm:$0xff] %vm355_vm4, %v1828_v11  ;;  %v193_v10 = vsel %vm1738_vm7, %v190_v0, %v187_v43  ;;  %v208_v44 = vmul.f32 %v1718_v51, %v207_v7  ;;  %v121_v31 = vmul.f32 1.442695, %v94_v38  ;;  %v1880_v51 = vld [vmem:[%s2715_s3 + $0x38] sm:$0xff]  ;;  %vm1889_vm9 = vcmp.lt.f32.partialorder %v209_v59, 0.0004427343 }
  0x2d   :  { %v212_v18 = vadd.f32 1.0, %v1841_v26  ;;  %359 = vst.msk [vmem:[#allocation2 + $0x18] sm:$0xff] %vm355_vm4, %v1843_v4  ;;  %v328_v34 = vmul.f32 %v1835_v25, %v1847_v9  ;;  %v1869_v35 = vadd.f32 %v327_v20, %v311_v15  ;;  %v202_v23 = vsel %vm1774_vm8, %v199_v63, %v196_v17  ;;  %v1918_v7 = vld [vmem:[%s2715_s3 + $0x40] sm:$0xff]  ;;  %v1923_v38 = vld [vmem:[%s2714_s2 + $0x70] sm:$0xff]  ;;  %v1942_v63 = vld [vmem:[%s2714_s2 + $0x78] sm:$0xff] }
  0x2e   :  { %v1875_v0 = vadd.f32 %v193_v10, %v57_v46  ;;  %v1357_v39 = vpop.eup %1356  ;;  %v1884_v1 = vadd.f32 %v202_v23, %v58_v57  ;;  %v215_v22 = vmul.f32 -0.5, %v1841_v26  ;;  %v1897_v46 = vld [vmem:[%s2714_s2 + $0x60] sm:$0xff]  ;;  %v80_v61 = vand.u32 2147483647, %v1902_v24 }
  0x2f   :  { %1358 = vlog2.f32 %v212_v18  ;;  %v1904_v57 = vadd.f32 %v328_v34, %v312_v28  ;;  %360 = vst.msk [vmem:[#allocation2 + $0x20] sm:$0xff] %vm355_vm4, %v1869_v35  ;;  %v205_v53 = vmul.f32 0.6931472, %v1357_v39  ;;  %v79_v12 = vand.u32 2147483647, %v1897_v46  ;;  %v315_v43 = vld [vmem:[%s2713_s1 + $0x40] sm:$0xff] }
  0x30   :  { %v329_v48 = vmul.f32 %v1861_v16, %v1875_v0  ;;  %1360 = vpow2.f32 %v119_v33  ;;  %v1016_v54 = vld [vmem:[#allocation2] sm:$0xff]  ;;  %v330_v47 = vmul.f32 %v1880_v51, %v1884_v1  ;;  %v216_v15 = vadd.f32 1.0, %v215_v22 }
  0x31   :  { %1362 = vpow2.f32 %v121_v31  ;;  %v1017_v3 = vld [vmem:[#allocation2 + $0x8] sm:$0xff]  ;;  %361 = vst.msk [vmem:[#allocation2 + $0x28] sm:$0xff] %vm355_vm4, %v1904_v57  ;;  %v211_v42 = vsel %vm1889_vm9, %v208_v44, %v205_v53  ;;  %v95_v33 = vsub.f32 0.0, %v79_v12  ;;  %v96_v20 = vsub.f32 0.0, %v80_v61 }
  0x32   :  { %v1933_v8 = vadd.f32 %v329_v48, %v313_v40  ;;  %v1275_v59 = vpack.c.bf16 %v1017_v3, %v1016_v54  ;;  %v1944_v62 = vadd.f32 %v330_v47, %v314_v45  ;;  %v1948_v14 = vadd.f32 %v211_v42, %v59_v60 }
  0x33   :  { %v81_v17 = vand.u32 2147483647, %v1923_v38  ;;  %v1018_v28 = vld [vmem:[#allocation2 + $0x10] sm:$0xff]  ;;  %v218_v30 = vand.u32 2147483647, %v1841_v26  ;;  %v425_v40 = vmul.f32 %v1736_v19, %v1736_v19  ;;  %v426_v27 = vmul.f32 %v1752_v21, %v1752_v21 }
  0x34   :  { %362 = vst.msk [vmem:[#allocation2 + $0x30] sm:$0xff] %vm355_vm4, %v1933_v8  ;;  %1277 = vmatpush3.bf16.xpose.msk.msra.mxu0 %vm1927_vm10, %v1275_v59  ;;  %363 = vst.msk [vmem:[#allocation2 + $0x38] sm:$0xff] %vm355_vm4, %v1944_v62  ;;  %v331_v60 = vmul.f32 %v1918_v7, %v1948_v14  ;;  %v82_v10 = vand.u32 2147483647, %v1942_v63  ;;  %v1019_v44 = vld [vmem:[#allocation2 + $0x18] sm:$0xff]  ;;  %v60_v22 = vmax.f32 %v1673_v32, 0.0  ;;  %v217_v45 = vmul.f32 %v1841_v26, %v216_v15 }
  0x35   :  { %1278 = vmatprep.subr.bf16.mxu0 %v1560_v2  ;;  %v123_v18 = vmul.f32 1.442695, %v95_v33  ;;  %v125_v31 = vmul.f32 1.442695, %v96_v20  ;;  %v97_v34 = vsub.f32 0.0, %v81_v17  ;;  %v1279_v54 = vpack.c.bf16 %v1019_v44, %v1018_v28  ;;  %v300_v59 = vld [vmem:[%s2715_s3 + $0x48] sm:$0xff] }
  0x36   :  { %v1965_v23 = vadd.f32 %v331_v60, %v315_v43  ;;  %v98_v39 = vsub.f32 0.0, %v82_v10  ;;  %vm1973_vm11 = vcmp.lt.f32.partialorder %v218_v30, 0.0004427343  ;;  %v427_v42 = vmul.f32 %v1772_v37, %v1772_v37  ;;  %v1020_v17 = vld [vmem:[#allocation2 + $0x20] sm:$0xff] }
  0x37   :  { %1364 = vpow2.f32 %v123_v18  ;;  %v127_v48 = vmul.f32 1.442695, %v97_v34  ;;  %v1988_v12 = vmul.f32 %v1789_v52, %v1789_v52  ;;  %v1998_v43 = vmul.f32 %v1814_v58, %v1814_v58  ;;  %v316_v58 = vld [vmem:[%s2713_s1 + $0x48] sm:$0xff] }
  0x38   :  { %364 = vst.msk [vmem:[#allocation2 + $0x40] sm:$0xff] %vm355_vm4, %v1965_v23  ;;  %1366 = vpow2.f32 %v125_v31  ;;  %v129_v19 = vmul.f32 1.442695, %v98_v39  ;;  %v2000_v33 = vmul.f32 0.5, %v425_v40  ;;  %v2008_v52 = vmul.f32 %v1835_v25, %v1835_v25  ;;  %v1021_v28 = vld [vmem:[#allocation2 + $0x28] sm:$0xff] }
  0x39   :  { %v1359_v53 = vpop.eup %1358  ;;  %1368 = vpow2.f32 %v127_v48  ;;  %v2010_v20 = vmul.f32 0.5, %v426_v27  ;;  %v2019_v60 = vmul.f32 %v1861_v16, %v1861_v16  ;;  %v2023_v25 = vmul.f32 %v1880_v51, %v1880_v51 }
  0x3a   :  { %v1979_v3 = vpop.eup %1360  ;;  %v214_v21 = vmul.f32 0.6931472, %v1359_v53  ;;  %1370 = vpow2.f32 %v129_v19  ;;  %v2030_v18 = vmul.f32 %v1918_v7, %v1918_v7  ;;  %v61_v31 = vmax.f32 %v1683_v41, 0.0  ;;  %v301_v53 = vld [vmem:[%s2715_s3 + $0x50] sm:$0xff]  ;;  %v302_v19 = vld [vmem:[%s2715_s3 + $0x58] sm:$0xff] }
  0x3b   :  { %v1981_v32 = vpop.eup %1362  ;;  %v221_v26 = vadd.f32 1.0, %v1979_v3  ;;  %v224_v30 = vmul.f32 -0.5, %v1979_v3  ;;  %v62_v34 = vmax.f32 %v1692_v49, 0.0  ;;  %v2035_v39 = vmul.f32 %v300_v59, %v300_v59 }
  0x3c   :  { %v220_v61 = vsel %vm1973_vm11, %v217_v45, %v214_v21  ;;  %v230_v15 = vadd.f32 1.0, %v1981_v32  ;;  %1281 = vmatpush3.bf16.xpose.msk.msra.mxu0 %vm1927_vm10, %v1279_v54  ;;  %v233_v44 = vmul.f32 -0.5, %v1981_v32  ;;  %v1283_v51 = vpack.c.bf16 %v1021_v28, %v1020_v17  ;;  %v1022_v17 = vld [vmem:[#allocation2 + $0x30] sm:$0xff]  ;;  %v1023_v28 = vld [vmem:[#allocation2 + $0x38] sm:$0xff] }
  0x3d   :  { %v2004_v37 = vadd.f32 %v220_v61, %v60_v22  ;;  %1372 = vlog2.f32 %v221_v26  ;;  %1282 = vmatprep.subr.bf16.mxu0 %v1560_v2  ;;  %v225_v22 = vadd.f32 1.0, %v224_v30  ;;  %v227_v7 = vand.u32 2147483647, %v1979_v3 }
  0x3e   :  { %1374 = vlog2.f32 %v230_v15  ;;  %v234_v48 = vadd.f32 1.0, %v233_v44  ;;  %v2064_v26 = vmul.f32 %v301_v53, %v301_v53  ;;  %v2073_v15 = vmul.f32 0.5, %v427_v42 }
  0x3f   :  { %v332_v10 = vmul.f32 %v300_v59, %v2004_v37  ;;  %1376 = vlog2.f32 %v1747_v5  ;;  %v2071_v59 = vmul.f32 %v302_v19, %v302_v19  ;;  %vm2077_vm12 = vcmp.lt.f32.partialorder %v227_v7, 0.0004427343 }
  0x40   :  { %1378 = vlog2.f32 %v1757_v29  ;;  %v235_v44 = vmul.f32 %v1981_v32, %v234_v48  ;;  %v1287_v7 = vpack.c.bf16 %v1023_v28, %v1022_v17  ;;  %vm1562_vm5 = vmmov 0  }
  0x41   :  { %v2037_v40 = vadd.f32 %v332_v10, %v316_v58  ;;  %v2041_v5 = vpop.eup %1364  ;;  %1380 = vlog2.f32 %v1784_v36  ;;  %v236_v36 = vand.u32 2147483647, %v1981_v32  ;;  %v2092_v32 = vmul.f32 0.5, %v1988_v12 }
  0x42   :  { %v2046_v45 = vpop.eup %1366  ;;  %v239_v29 = vadd.f32 1.0, %v2041_v5  ;;  %1382 = vlog2.f32 %v1795_v55  ;;  %v242_v30 = vmul.f32 -0.5, %v2041_v5  ;;  %vm947_vm6 = vcmask 1040384  }
  0x43   :  { %365 = vst.msk [vmem:[#allocation2 + $0x48] sm:$0xff] %vm355_vm4, %v2037_v40  ;;  %v2056_v47 = vpop.eup %1368  ;;  %v248_v21 = vadd.f32 1.0, %v2046_v45  ;;  %1384 = vlog2.f32 %v1822_v13  ;;  %v226_v13 = vmul.f32 %v1979_v3, %v225_v22  ;;  %vm2085_vm13 = vcmp.lt.f32.partialorder %v236_v36, 0.0004427343 }
  0x44   :  { %v2066_v61 = vpop.eup %1370  ;;  %1285 = vmatpush3.bf16.xpose.msk.msra.mxu0 %vm1927_vm10, %v1283_v51  ;;  %1386 = vlog2.f32 %v239_v29  ;;  %v257_v55 = vadd.f32 1.0, %v2056_v47  ;;  %v251_v51 = vmul.f32 -0.5, %v2046_v45  ;;  %v260_v3 = vmul.f32 -0.5, %v2056_v47 }
  0x45   :  { %1286 = vmatprep.subr.bf16.mxu0 %v1560_v2  ;;  %1388 = vlog2.f32 %v248_v21  ;;  %v266_v42 = vadd.f32 1.0, %v2066_v61  ;;  %v245_v36 = vand.u32 2147483647, %v2041_v5  ;;  %v254_v28 = vand.u32 2147483647, %v2046_v45 }
  0x46   :  { %1390 = vlog2.f32 %v257_v55  ;;  %v243_v55 = vadd.f32 1.0, %v242_v30  ;;  %v252_v17 = vadd.f32 1.0, %v251_v51  ;;  %v2121_v30 = vmul.f32 0.5, %v1998_v43 }
  0x47   :  { %v1373_v10 = vpop.eup %1372  ;;  %1392 = vlog2.f32 %v1847_v9  ;;  %vm2126_vm14 = vcmp.lt.f32.partialorder %v245_v36, 0.0004427343  ;;  %vm2133_vm15 = vcmp.lt.f32.partialorder %v254_v28, 0.0004427343 }
  0x48   :  { %v1375_v29 = vpop.eup %1374  ;;  %v223_v54 = vmul.f32 0.6931472, %v1373_v10  ;;  %1394 = vlog2.f32 %v266_v42  ;;  %v269_v10 = vmul.f32 -0.5, %v2066_v61 }
  0x49   :  { %v1377_v22 = vpop.eup %1376  ;;  %v232_v21 = vmul.f32 0.6931472, %v1375_v29  ;;  %1396 = vlog2.f32 %v1875_v0  ;;  %v1024_v0 = vld [vmem:[#allocation2 + $0x40] sm:$0xff] }
  0x4a   :  { %v229_v48 = vsel %vm2077_vm12, %v226_v13, %v223_v54  ;;  %v2098_v27 = vpop.eup %1378  ;;  %v317_v54 = vld [vmem:[%s2713_s1 + $0x50] sm:$0xff]  ;;  %v261_v13 = vadd.f32 1.0, %v260_v3  ;;  %v2110_v58 = vmul.f32 0.6931472, %v1377_v22  ;;  %1398 = vlog2.f32 %v1884_v1  ;;  %v1025_v51 = vld [vmem:[#allocation2 + $0x48] sm:$0xff]  ;;  %v319_v22 = vld [vmem:[%s2713_s1 + $0x60] sm:$0xff] }
  0x4b   :  { %v238_v9 = vsel %vm2085_vm13, %v235_v44, %v232_v21  ;;  %v285_v16 = vadd.f32 %v229_v48, %v61_v31  ;;  %v1381_v42 = vpop.eup %1380  ;;  %v318_v31 = vld [vmem:[%s2713_s1 + $0x58] sm:$0xff]  ;;  %v244_v3 = vmul.f32 %v2041_v5, %v243_v55  ;;  %v253_v1 = vmul.f32 %v2046_v45, %v252_v17 }
  0x4c   :  { %v2105_v12 = vadd.f32 %v238_v9, %v62_v34  ;;  %v1383_v41 = vpop.eup %1382  ;;  %1289 = vmatpush3.bf16.xpose.msk.msra.mxu0 %vm1927_vm10, %v1287_v7  ;;  %v263_v34 = vand.u32 2147483647, %v2056_v47  ;;  %v272_v48 = vand.u32 2147483647, %v2066_v61  ;;  %v262_v55 = vmul.f32 %v2056_v47, %v261_v13 }
  0x4d   :  { %v333_v49 = vmul.f32 %v301_v53, %v285_v16  ;;  %v1385_v44 = vpop.eup %1384  ;;  %1290 = vmatprep.subr.bf16.mxu0 %v1560_v2  ;;  %v270_v53 = vadd.f32 1.0, %v269_v10  ;;  %1400 = vlog2.f32 %v1948_v14  ;;  %v1291_v10 = vpack.c.bf16 %v1025_v51, %v1024_v0  ;;  %v303_v14 = vld [vmem:[%s2715_s3 + $0x60] sm:$0xff]  ;;  %v2164_v51 = vld [vmem:[%s2715_s3 + $0x68] sm:$0xff] }
  0x4e   :  { %v334_v29 = vmul.f32 %v302_v19, %v2105_v12  ;;  %v1387_v7 = vpop.eup %1386  ;;  %vm2144_vm0 = vcmp.lt.f32.partialorder %v263_v34, 0.0004427343  ;;  %v398_v28 = vmul.f32 0.6931472, %v1381_v42  ;;  %1402 = vlog2.f32 %v2004_v37 }
  0x4f   :  { %v2130_v21 = vadd.f32 %v333_v49, %v317_v54  ;;  %v1389_v9 = vpop.eup %1388  ;;  %v241_v5 = vmul.f32 0.6931472, %v1387_v7  ;;  %v2754_v34 = vmax.f32 %v1897_v46, 0.0  ;;  %vm2166_vm1 = vcmp.lt.f32.partialorder %v272_v48, 0.0004427343  ;;  %v2180_v7 = vld [vmem:[%s2715_s3 + $0x70] sm:$0xff] }
  0x50   :  { %v2138_v19 = vadd.f32 %v334_v29, %v318_v31  ;;  %v1391_v36 = vpop.eup %1390  ;;  %v250_v45 = vmul.f32 0.6931472, %v1389_v9  ;;  %v271_v31 = vmul.f32 %v2066_v61, %v270_v53  ;;  %v2757_v61 = vmax.f32 %v1902_v24, 0.0  ;;  %v320_v24 = vld [vmem:[%s2713_s1 + $0x68] sm:$0xff] }
  0x51   :  { %366 = vst.msk [vmem:[#allocation2 + $0x50] sm:$0xff] %vm355_vm4, %v2130_v21  ;;  %v1393_v54 = vpop.eup %1392  ;;  %v247_v47 = vsel %vm2126_vm14, %v244_v3, %v241_v5  ;;  %v259_v13 = vmul.f32 0.6931472, %v1391_v36  ;;  %v400_v3 = vmul.f32 0.6931472, %v1383_v41  ;;  %1404 = vlog2.f32 %v285_v16  ;;  %v2198_v36 = vld [vmem:[%s2715_s3 + $0x78] sm:$0xff] }
  0x52   :  { %367 = vst.msk [vmem:[#allocation2 + $0x58] sm:$0xff] %vm355_vm4, %v2138_v19  ;;  %v1395_v49 = vpop.eup %1394  ;;  %v256_v42 = vsel %vm2133_vm15, %v253_v1, %v250_v45  ;;  %v287_v0 = vadd.f32 %v247_v47, %v2754_v34  ;;  %v2758_v1 = vmax.f32 %v1923_v38, 0.0  ;;  %v396_v48 = vmul.f32 0.6931472, %v2098_v27  ;;  %v321_v38 = vld [vmem:[%s2713_s1 + $0x70] sm:$0xff] }
  0x53   :  { %v288_v37 = vadd.f32 %v256_v42, %v2757_v61  ;;  %v265_v46 = vsel %vm2144_vm0, %v262_v55, %v259_v13  ;;  %v268_v53 = vmul.f32 0.6931472, %v1395_v49  ;;  %v446_v9 = vmul.f32 0.5, %v2008_v52  ;;  %v1397_v5 = vpop.eup %1396  ;;  %v322_v42 = vld [vmem:[%s2713_s1 + $0x78] sm:$0xff] }
  0x54   :  { %1293 = vmatpush3.bf16.xpose.msk.msra.mxu0 %vm1927_vm10, %v1291_v10  ;;  %v335_v41 = vmul.f32 %v303_v14, %v287_v0  ;;  %v289_v43 = vadd.f32 %v265_v46, %v2758_v1  ;;  %v402_v27 = vmul.f32 0.6931472, %v1385_v44  ;;  %1406 = vlog2.f32 %v2105_v12  ;;  %v1399_v52 = vpop.eup %1398 }
  0x55   :  { %1294 = vmatprep.subr.bf16.mxu0 %v1560_v2  ;;  %v336_v16 = vmul.f32 %v2164_v51, %v288_v37  ;;  %v274_v55 = vsel %vm2166_vm1, %v271_v31, %v268_v53  ;;  %v2759_v45 = vmax.f32 %v1942_v63, 0.0  ;;  %v459_v13 = vadd.f32 %v2073_v15, %v398_v28 }
  0x56   :  { %v2204_v10 = vadd.f32 %v335_v41, %v319_v22  ;;  %v337_v47 = vmul.f32 %v2180_v7, %v289_v43  ;;  %v404_v44 = vmul.f32 0.6931472, %v1393_v54  ;;  %v447_v12 = vmul.f32 0.5, %v2019_v60 }
  0x57   :  { %v290_v17 = vadd.f32 %v274_v55, %v2759_v45  ;;  %v2210_v49 = vadd.f32 %v336_v16, %v320_v24  ;;  %v460_v34 = vadd.f32 %v2092_v32, %v400_v3  ;;  %1408 = vlog2.f32 %v287_v0  ;;  %v1401_v28 = vpop.eup %1400 }
  0x58   :  { %v1026_v31 = vld [vmem:[#allocation2 + $0x50] sm:$0xff]  ;;  %368 = vst.msk [vmem:[#allocation2 + $0x60] sm:$0xff] %vm355_vm4, %v2204_v10  ;;  %v2220_v61 = vadd.f32 %v337_v47, %v321_v38  ;;  %v457_v15 = vadd.f32 %v2000_v33, %v2110_v58  ;;  %v406_v60 = vmul.f32 0.6931472, %v1397_v5  ;;  %v458_v32 = vadd.f32 %v2010_v20, %v396_v48  ;;  %v1403_v53 = vpop.eup %1402 }
  0x59   :  { %v1027_v29 = vld [vmem:[#allocation2 + $0x58] sm:$0xff]  ;;  %v338_v63 = vmul.f32 %v2198_v36, %v290_v17  ;;  %369 = vst.msk [vmem:[#allocation2 + $0x68] sm:$0xff] %vm355_vm4, %v2210_v49  ;;  %v461_v54 = vadd.f32 %v2121_v30, %v402_v27  ;;  %1410 = vlog2.f32 %v288_v37  ;;  %v437_v0 = vmul.f32 %v303_v14, %v303_v14 }
  0x5a   :  { %v1295_v22 = vpack.c.bf16 %v1027_v29, %v1026_v31  ;;  %370 = vst.msk [vmem:[#allocation2 + $0x70] sm:$0xff] %vm355_vm4, %v2220_v61  ;;  %v475_v46 = vadd.f32 0.9189385, %v459_v13  ;;  %v408_v33 = vmul.f32 0.6931472, %v1399_v52  ;;  %v448_v58 = vmul.f32 0.5, %v2023_v25 }
  0x5b   :  { %v2228_v3 = vadd.f32 %v338_v63, %v322_v42  ;;  %v462_v24 = vadd.f32 %v446_v9, %v404_v44  ;;  %v476_v41 = vadd.f32 0.9189385, %v460_v34  ;;  %v410_v20 = vmul.f32 0.6931472, %v1401_v28  ;;  %v1405_v37 = vpop.eup %1404 }
  0x5c   :  { %1297 = vmatpush3.bf16.xpose.msk.msra.mxu0 %vm1927_vm10, %v1295_v22  ;;  %1412 = vlog2.f32 %v289_v43  ;;  %v449_v30 = vmul.f32 0.5, %v2030_v18  ;;  %v473_v1 = vadd.f32 0.9189385, %v457_v15  ;;  %v438_v14 = vmul.f32 %v2164_v51, %v2164_v51 }
  0x5d   :  { %371 = vst.msk [vmem:[#allocation2 + $0x78] sm:$0xff] %vm355_vm4, %v2228_v3  ;;  %1298 = vmatprep.subr.bf16.mxu0 %v1560_v2  ;;  %v463_v25 = vadd.f32 %v447_v12, %v406_v60  ;;  %v474_v48 = vadd.f32 0.9189385, %v458_v32  ;;  %v477_v9 = vadd.f32 0.9189385, %v461_v54  ;;  %1414 = vlog2.f32 %v290_v17 }
  0x5e   :  { %v412_v5 = vmul.f32 0.6931472, %v1403_v53  ;;  %v450_v16 = vmul.f32 0.5, %v2035_v39  ;;  %v875_v55 = vmul.f32 0.0, %v475_v46  ;;  %v1407_v38 = vpop.eup %1406  ;;  %v451_v43 = vmul.f32 0.5, %v2064_v26 }
  0x5f   :  { %v1028_v27 = vld [vmem:[#allocation2 + $0x60] sm:$0xff]  ;;  %v464_v18 = vadd.f32 %v448_v58, %v408_v33  ;;  %v478_v52 = vadd.f32 0.9189385, %v462_v24  ;;  %v876_v45 = vmul.f32 0.0, %v476_v41  ;;  %v414_v13 = vmul.f32 0.6931472, %v1405_v37 }
  0x60   :  { %v1029_v47 = vld [vmem:[#allocation2 + $0x68] sm:$0xff]  ;;  %v452_v31 = vmul.f32 0.5, %v2071_v59  ;;  %v465_v51 = vadd.f32 %v449_v30, %v410_v20  ;;  %v907_v42 = vsel %vm355_vm4, %v473_v1, 0.0  ;;  %v479_v12 = vadd.f32 0.9189385, %v463_v25 }
  0x61   :  { %v1299_v44 = vpack.c.bf16 %v1029_v47, %v1028_v27  ;;  %v877_v17 = vmul.f32 0.0, %v477_v9  ;;  %v908_v39 = vsel %vm355_vm4, %v474_v48, 0.0  ;;  %v1409_v34 = vpop.eup %1408  ;;  %v416_v29 = vmul.f32 0.6931472, %v1407_v38 }
  0x62   :  { %v466_v63 = vadd.f32 %v450_v16, %v412_v5  ;;  %v909_v15 = vadd.f32 %v908_v39, %v907_v42  ;;  %v910_v26 = vsel %vm355_vm4, %v875_v55, 0.0  ;;  %v439_v28 = vmul.f32 %v2180_v7, %v2180_v7  ;;  %v1030_v7 = vld [vmem:[#allocation2 + $0x70] sm:$0xff] }
  0x63   :  { %v480_v22 = vadd.f32 0.9189385, %v464_v18  ;;  %v878_v60 = vmul.f32 0.0, %v478_v52  ;;  %v912_v59 = vsel %vm355_vm4, %v876_v45, 0.0  ;;  %v1411_v32 = vpop.eup %1410  ;;  %v453_v54 = vmul.f32 0.5, %v437_v0 }
  0x64   :  { %1301 = vmatpush3.bf16.xpose.msk.msra.mxu0 %vm1927_vm10, %v1299_v44  ;;  %v467_v46 = vadd.f32 %v451_v43, %v414_v13  ;;  %v481_v53 = vadd.f32 0.9189385, %v465_v51  ;;  %v911_v33 = vadd.f32 %v910_v26, %v909_v15  ;;  %v418_v58 = vmul.f32 0.6931472, %v1409_v34  ;;  %v1031_v30 = vld [vmem:[#allocation2 + $0x78] sm:$0xff] }
  0x65   :  { %v440_v24 = vmul.f32 %v2198_v36, %v2198_v36  ;;  %v879_v41 = vmul.f32 0.0, %v479_v12  ;;  %v914_v20 = vsel %vm355_vm4, %v877_v17, 0.0  ;;  %1302 = vmatprep.subr.bf16.mxu0 %v1560_v2  ;;  %v454_v37 = vmul.f32 0.5, %v438_v14  ;;  %v2259_v0 = vld [vmem:[%s2717_s5] sm:$0x1] }
  0x66   :  { %v1413_v1 = vpop.eup %1412  ;;  %v468_v25 = vadd.f32 %v452_v31, %v416_v29  ;;  %v482_v48 = vadd.f32 0.9189385, %v466_v63  ;;  %v913_v9 = vadd.f32 %v912_v59, %v911_v33  ;;  %v420_v5 = vmul.f32 0.6931472, %v1411_v32 }
  0x67   :  { %v455_v16 = vmul.f32 0.5, %v439_v28  ;;  %v880_v36 = vmul.f32 0.0, %v480_v22  ;;  %v916_v55 = vsel %vm355_vm4, %v878_v60, 0.0  ;;  %v1415_v38 = vpop.eup %1414  ;;  %v483_v27 = vadd.f32 0.9189385, %v467_v46 }
  0x68   :  { %v881_v2 = vmul.f32 0.0, %v481_v53  ;;  %v915_v43 = vadd.f32 %v914_v20, %v913_v9  ;;  %v1303_v18 = vpack.c.bf16 %v1031_v30, %v1030_v7  ;;  %v422_v52 = vmul.f32 0.6931472, %v1413_v1 }
  0x69   :  { %v469_v14 = vadd.f32 %v453_v54, %v418_v58  ;;  %v918_v45 = vsel %vm355_vm4, %v879_v41, 0.0  ;;  %v374_v47 = vand.u32 2147483647, %v2259_v0  ;;  %v456_v13 = vmul.f32 0.5, %v440_v24 }
  0x6a   :  { %v484_v31 = vadd.f32 0.9189385, %v468_v25  ;;  %v882_v51 = vmul.f32 0.0, %v482_v48  ;;  %v917_v42 = vadd.f32 %v916_v55, %v915_v43  ;;  %v424_v44 = vmul.f32 0.6931472, %v1415_v38 }
  0x6b   :  { %v470_v12 = vadd.f32 %v454_v37, %v420_v5  ;;  %v920_v17 = vsel %vm355_vm4, %v880_v36, 0.0  ;;  %v375_v39 = vsub.f32 0.0, %v374_v47  ;;  %v883_v34 = vmul.f32 0.0, %v483_v27 }
  0x6c   :  { %v919_v29 = vadd.f32 %v918_v45, %v917_v42  ;;  %1305 = vmatpush3.bf16.xpose.msk.msra.mxu0 %vm1927_vm10, %v1303_v18  ;;  %v471_v63 = vadd.f32 %v455_v16, %v422_v52  ;;  %v485_v15 = vadd.f32 0.9189385, %v469_v14  ;;  %v922_v26 = vsel %vm355_vm4, %v881_v2, 0.0  ;;  %v388_v45 = vld [vmem:[%s2718_s6] sm:$0x1] }
  0x6d   :  { %v376_v28 = vmul.f32 1.442695, %v375_v39  ;;  %v884_v22 = vmul.f32 0.0, %v484_v31  ;;  %v472_v59 = vadd.f32 %v456_v13, %v424_v44  ;;  %v486_v32 = vadd.f32 0.9189385, %v470_v12 }
  0x6e   :  { %v921_v60 = vadd.f32 %v920_v17, %v919_v29  ;;  %v924_v54 = vsel %vm355_vm4, %v882_v51, 0.0  ;;  %v487_v53 = vadd.f32 0.9189385, %v471_v63  ;;  %v885_v33 = vmul.f32 0.0, %v485_v15 }
  0x6f   :  { %1416 = vpow2.f32 %v376_v28  ;;  %v926_v58 = vsel %vm355_vm4, %v883_v34, 0.0  ;;  %v488_v6 = vadd.f32 0.9189385, %v472_v59  ;;  %v886_v41 = vmul.f32 0.0, %v486_v32 }
  0x70   :  { %v923_v46 = vadd.f32 %v922_v26, %v921_v60  ;;  %v928_v20 = vsel %vm355_vm4, %v884_v22, 0.0  ;;  %v887_v30 = vmul.f32 0.0, %v487_v53  ;;  %v930_v1 = vsel %vm355_vm4, %v885_v33, 0.0 }
  0x71   :  { %v888_v25 = vmul.f32 0.0, %v488_v6  ;;  %v932_v48 = vsel %vm355_vm4, %v886_v41, 0.0  ;;  %v867_v36 = vlaneseq  ;;  %v495_v43 = vmul.f32 %v1791_v50, %v1791_v50 }
  0x72   :  { %v925_v24 = vadd.f32 %v924_v54, %v923_v46  ;;  %v934_v16 = vsel %vm355_vm4, %v887_v30, 0.0  ;;  %v496_v47 = vmul.f32 %v1802_v56, %v1802_v56  ;;  %v491_v13 = vmul.f32 %v388_v45, %v388_v45 }
  0x73   :  { %v936_v27 = vsel %vm355_vm4, %v888_v25, 0.0  ;;  %v868_v52 = vand.u32 127, %v867_v36  ;;  %v497_v31 = vmul.f32 %v1828_v11, %v1828_v11  ;;  %v543_v51 = vmul.f32 -81376.9, %v495_v43 }
  0x74   :  { %v927_v7 = vadd.f32 %v926_v58, %v925_v24  ;;  %v498_v50 = vmul.f32 %v1843_v4, %v1843_v4  ;;  %v373_v44 = vmax.f32 %v2259_v0, 0.0  ;;  %v544_v17 = vmul.f32 -81376.9, %v496_v47 }
  0x75   :  { %vm870_vm2 = vcmp.lt.s32.totalorder %v868_v52, 16  ;;  %v2287_v39 = vmul.f32 0.5, %v491_v13  ;;  %v499_v56 = vmul.f32 %v1869_v35, %v1869_v35  ;;  %v500_v34 = vmul.f32 %v1904_v57, %v1904_v57 }
  0x76   :  { %v929_v37 = vadd.f32 %v928_v20, %v927_v7  ;;  %v545_v11 = vmul.f32 -81376.9, %v497_v31  ;;  %v1561_v29 = vmov 0.0   ;;  %v501_v15 = vmul.f32 %v1933_v8, %v1933_v8  ;;  %v389_v20 = vld [vmem:[%s2716_s4] sm:$0x1]  ;;  %s1563_s4 = smov [#allocation4]  }
  0x77   :  { %v2293_v63 = vsel %vm870_vm2, 1.0, %v1561_v29  ;;  %v502_v4 = vmul.f32 %v1944_v62, %v1944_v62  ;;  %v559_v0 = vmul.f32 1.442695, %v543_v51  ;;  %v503_v28 = vmul.f32 %v1965_v23, %v1965_v23  ;;  %1271 = vmatprep.mubr.msk.f32.mxu0 %vm1562_vm5, %v1561_v29  ;;  %s1168_s22 = sshll.u32 %s1563_s4, 4  ;;  %s1169_s22 = int_to_ptr.vmem [resolvable:$true] %s1168_s22 }
  0x78   :  { %v931_v9 = vadd.f32 %v930_v1, %v929_v37  ;;  %v504_v35 = vmul.f32 %v2037_v40, %v2037_v40  ;;  %v546_v22 = vmul.f32 -81376.9, %v498_v50  ;;  %v505_v8 = vmul.f32 %v2130_v21, %v2130_v21  ;;  %s1490_s23 = scalar_lea.vmem %s1169_s22, 128  ;;  %p1495_p1 = scmp.lt.s32.totalorder %s1169_s22, %s1169_s22 }
  0x79   :  { %v1417_v5 = vpop.eup %1416  ;;  %v506_v62 = vmul.f32 %v2138_v19, %v2138_v19  ;;  %v561_v59 = vmul.f32 1.442695, %v544_v17  ;;  %v507_v23 = vmul.f32 %v2204_v10, %v2204_v10  ;;  %v508_v40 = vmul.f32 %v2210_v49, %v2210_v49  ;;  %v1015_v19 = vld [vmem:[%s2712_s0] sm:$0xff]  ;;  %p1491_p0 = scmp.ne.s32.totalorder %s1169_s22, %s1490_s23  ;;  %p1496_p2 = scmp.lt.s32.totalorder %s1490_s23, %s1490_s23 }
  0x7a   :  { %v933_v55 = vadd.f32 %v932_v48, %v931_v9  ;;  %v378_v38 = vadd.f32 1.0, %v1417_v5  ;;  %v381_v18 = vmul.f32 -0.5, %v1417_v5  ;;  %v384_v12 = vand.u32 2147483647, %v1417_v5  ;;  %1272 = vmatmul.mubr.msk.f32.vlgmr.msra.gmra.mrb[0].mxu0 %vm355_vm4, %v1015_v19 }
  0x7b   :  { %v563_v54 = vmul.f32 1.442695, %v545_v11  ;;  %v509_v46 = vmul.f32 %v2220_v61, %v2220_v61  ;;  %v2319_v53 = vmul.f32 %v2228_v3, %v2228_v3  ;;  %v547_v21 = vmul.f32 -81376.9, %v499_v56  ;;  %p1497_p3 = por %p1496_p2, %p1495_p1 }
  0x7c   :  { %v935_v2 = vadd.f32 %v934_v16, %v933_v55  ;;  %1418 = vlog2.f32 %v378_v38  ;;  %v382_v42 = vadd.f32 1.0, %v381_v18  ;;  %vm2303_vm3 = vcmp.lt.f32.partialorder %v384_v12, 0.0004427343 }
  0x7d   :  { %1420 = vpow2.f32 %v559_v0  ;;  %v2326_v33 = vmul.f32 0.5, %v495_v43  ;;  %v565_v49 = vmul.f32 1.442695, %v546_v22  ;;  %v2328_v24 = vmul.f32 0.5, %v496_v47  ;;  %p1498_p4 = pnand %p1497_p3, %p1491_p0 }
  0x7e   :  { %v937_v14 = vadd.f32 %v936_v27, %v935_v2  ;;  %v383_v26 = vmul.f32 %v1417_v5, %v382_v42  ;;  %v548_v61 = vmul.f32 -81376.9, %v500_v34  ;;  %1422 = vpow2.f32 %v561_v59 }
  0x7f   :  { %v2330_v3 = vmul.f32 0.5, %v497_v31  ;;  %v2332_v6 = vmul.f32 0.5, %v498_v50  ;;  %v549_v41 = vmul.f32 -81376.9, %v501_v15  ;;  %1424 = vpow2.f32 %v563_v54 }
  0x80   :  { %938 = vadd.xlane.f32.xlu0 %v937_v14  ;;  %v2338_v30 = vmul.f32 0.5, %v499_v56  ;;  %v567_v1 = vmul.f32 1.442695, %v547_v21  ;;  %v2340_v37 = vmul.f32 0.5, %v500_v34  ;;  %v2342_v25 = vmul.f32 0.5, %v501_v15 }
  0x81   :  { %v550_v48 = vmul.f32 -81376.9, %v502_v4  ;;  %v2344_v9 = vmul.f32 0.5, %v502_v4  ;;  %v551_v5 = vmul.f32 -81376.9, %v503_v28  ;;  %v2348_v55 = vmul.f32 0.5, %v503_v28 }
  0x82   :  { %v569_v16 = vmul.f32 1.442695, %v548_v61  ;;  %v2350_v38 = vmul.f32 0.5, %v504_v35  ;;  %v552_v27 = vmul.f32 -81376.9, %v504_v35  ;;  %v2352_v43 = vmul.f32 0.5, %v505_v8 }
  0x83   :  { %v571_v2 = vmul.f32 1.442695, %v549_v41  ;;  %v2354_v18 = vmul.f32 0.5, %v506_v62  ;;  %v553_v52 = vmul.f32 -81376.9, %v505_v8  ;;  %v2357_v14 = vmul.f32 0.5, %v507_v23 }
  0x84   :  { %v554_v47 = vmul.f32 -81376.9, %v506_v62  ;;  %v573_v13 = vmul.f32 1.442695, %v550_v48  ;;  %v2361_v51 = vmul.f32 0.5, %v509_v46 }
  0x85   :  { %v555_v42 = vmul.f32 -81376.9, %v507_v23  ;;  %v575_v50 = vmul.f32 1.442695, %v551_v5  ;;  %v556_v12 = vmul.f32 -81376.9, %v508_v40 }
  0x86   :  { %v1419_v57 = vpop.eup %1418  ;;  %v577_v17 = vmul.f32 1.442695, %v552_v27  ;;  %v557_v11 = vmul.f32 -81376.9, %v509_v46  ;;  %v579_v29 = vmul.f32 1.442695, %v553_v52 }
  0x87   :  { %v380_v32 = vmul.f32 0.6931472, %v1419_v57  ;;  %v1421_v31 = vpop.eup %1420  ;;  %v529_v4 = vsub.f32 -1.6120857, %v2330_v3  ;;  %v581_v0 = vmul.f32 1.442695, %v554_v47 }
  0x88   :  { %v1423_v56 = vpop.eup %1422  ;;  %v530_v35 = vsub.f32 -1.6120857, %v2332_v6  ;;  %v558_v22 = vmul.f32 -81376.9, %v2319_v53  ;;  %v583_v57 = vmul.f32 1.442695, %v555_v42 }
  0x89   :  { %v386_v10 = vsel %vm2303_vm3, %v383_v26, %v380_v32  ;;  %v1425_v15 = vpop.eup %1424  ;;  %v2366_v26 = vmul.f32 403.4288, %v1421_v31  ;;  %v585_v62 = vmul.f32 1.442695, %v556_v12  ;;  %v2370_v59 = vmul.f32 403.4288, %v1423_v56 }
  0x8a   :  { %v387_v58 = vadd.f32 %v386_v10, %v373_v44  ;;  %v587_v23 = vmul.f32 1.442695, %v557_v11 }
  0x8b   :  { %v607_v21 = vadd.f32 1.0, %v2366_v26 }
  0x8c   :  { %v390_v7 = vmul.f32 %v388_v45, %v387_v58  ;;  %1426 = vlog2.f32 %v387_v58  ;;  %v2359_v45 = vmul.f32 0.5, %v508_v40  ;;  %v2373_v40 = vmul.f32 403.4288, %v1425_v15 }
  0x8d   :  { %1428 = vpow2.f32 %v565_v49  ;;  %v589_v49 = vmul.f32 1.442695, %v558_v22  ;;  %v622_v22 = vand.u32 2147483647, %v2370_v59 }
  0x8e   :  { %v2346_v36 = vadd.f32 %v390_v7, %v389_v20  ;;  %1430 = vpow2.f32 %v567_v1  ;;  %v616_v20 = vadd.f32 1.0, %v2370_v59  ;;  %v610_v1 = vmul.f32 -0.5, %v2366_v26 }
  0x8f   :  { %1432 = vpow2.f32 %v569_v16  ;;  %v625_v48 = vadd.f32 1.0, %v2373_v40  ;;  %vm2428_vm8 = vcmp.lt.f32.partialorder %v622_v22, 0.0004427343 }
  0x90   :  { %392 = vst [vmem:[#allocation3] sm:$0x1] %v2346_v36  ;;  %1434 = vpow2.f32 %v571_v2  ;;  %v619_v2 = vmul.f32 -0.5, %v2370_v59  ;;  %v611_v11 = vadd.f32 1.0, %v610_v1 }
  0x91   :  { %1436 = vpow2.f32 %v573_v13 }
  0x92   :  { %1438 = vpow2.f32 %v575_v50 }
  0x93   :  { %1440 = vpow2.f32 %v577_v17 }
  0x94   :  { %1442 = vpow2.f32 %v579_v29  ;;  %v613_v29 = vand.u32 2147483647, %v2366_v26 }
  0x95   :  { %1444 = vpow2.f32 %v581_v0 }
  0x96   :  { %v1427_v28 = vpop.eup %1426  ;;  %1446 = vpow2.f32 %v583_v57  ;;  %vm2416_vm7 = vcmp.lt.f32.partialorder %v613_v29, 0.0004427343 }
  0x97   :  { %v1429_v60 = vpop.eup %1428  ;;  %v490_v8 = vmul.f32 0.6931472, %v1427_v28  ;;  %1448 = vpow2.f32 %v585_v62  ;;  %v620_v28 = vadd.f32 1.0, %v619_v2 }
  0x98   :  { %v1431_v19 = vpop.eup %1430  ;;  %v2379_v58 = vmul.f32 403.4288, %v1429_v60  ;;  %1450 = vpow2.f32 %v587_v23  ;;  %v628_v23 = vmul.f32 -0.5, %v2373_v40 }
  0x99   :  { %v493_v54 = vadd.f32 %v2287_v39, %v490_v8  ;;  %v1433_v7 = vpop.eup %1432  ;;  %v2387_v27 = vmul.f32 403.4288, %v1431_v19  ;;  %1452 = vlog2.f32 %v607_v21  ;;  %v2407_v21 = vmul.f32 0.5, %v2319_v53 }
  0x9a   :  { %v1435_v5 = vpop.eup %1434  ;;  %1454 = vpow2.f32 %v589_v49  ;;  %v634_v13 = vadd.f32 1.0, %v2379_v58  ;;  %v2395_v12 = vmul.f32 403.4288, %v1433_v7  ;;  %v631_v49 = vand.u32 2147483647, %v2373_v40 }
  0x9b   :  { %v494_v61 = vadd.f32 0.9189385, %v493_v54  ;;  %v1437_v31 = vpop.eup %1436  ;;  %1456 = vlog2.f32 %v616_v20  ;;  %v2397_v56 = vmul.f32 403.4288, %v1435_v5  ;;  %v643_v57 = vadd.f32 1.0, %v2387_v27 }
  0x9c   :  { %v1439_v17 = vpop.eup %1438  ;;  %1458 = vlog2.f32 %v625_v48  ;;  %v2409_v19 = vmul.f32 403.4288, %v1437_v31  ;;  %v2414_v7 = vmul.f32 %v611_v11, %v2366_v26  ;;  %v2423_v53 = vmul.f32 %v2346_v36, %v2346_v36 }
  0x9d   :  { %v905_v16 = vmul.f32 %v2293_v63, %v494_v61  ;;  %v1441_v15 = vpop.eup %1440  ;;  %1460 = vlog2.f32 %v634_v13  ;;  %v652_v61 = vadd.f32 1.0, %v2395_v12  ;;  %v661_v48 = vadd.f32 1.0, %v2397_v56 }
  0x9e   :  { %v1443_v60 = vpop.eup %1442  ;;  %v637_v26 = vmul.f32 -0.5, %v2379_v58  ;;  %v640_v13 = vand.u32 2147483647, %v2379_v58  ;;  %1462 = vlog2.f32 %v643_v57  ;;  %v2436_v11 = vmul.f32 403.4288, %v1441_v15 }
  0x9f   :  { %v948_v42 = vsel %vm947_vm6, %v905_v16, 0.0  ;;  %v1445_v54 = vpop.eup %1444  ;;  %v2426_v16 = vmul.f32 %v620_v28, %v2370_v59  ;;  %v629_v36 = vadd.f32 1.0, %v628_v23  ;;  %v646_v29 = vmul.f32 -0.5, %v2387_v27 }
  0xa0   :  { %949 = vadd.xlane.f32.xlu0 %v948_v42  ;;  %v1447_v20 = vpop.eup %1446  ;;  %v2434_v42 = vmul.f32 403.4288, %v1439_v17  ;;  %vm2439_vm9 = vcmp.lt.f32.partialorder %v631_v49, 0.0004427343  ;;  %v649_v28 = vand.u32 2147483647, %v2387_v27  ;;  %1464 = vlog2.f32 %v652_v61 }
  0xa1   :  { %v1449_v5 = vpop.eup %1448  ;;  %v670_v22 = vadd.f32 1.0, %v2409_v19  ;;  %v2445_v57 = vmul.f32 403.4288, %v1443_v60  ;;  %v2447_v17 = vmul.f32 403.4288, %v1445_v54  ;;  %1466 = vlog2.f32 %v661_v48 }
  0xa2   :  { %v1451_v31 = vpop.eup %1450  ;;  %v2449_v15 = vmul.f32 403.4288, %v1447_v20  ;;  %v2451_v0 = vmul.f32 403.4288, %v1449_v5  ;;  %v638_v49 = vadd.f32 1.0, %v637_v26  ;;  %v655_v61 = vmul.f32 -0.5, %v2395_v12 }
  0xa3   :  { %v1453_v62 = vpop.eup %1452  ;;  %vm2453_vm10 = vcmp.lt.f32.partialorder %v640_v13, 0.0004427343  ;;  %v2458_v52 = vmul.f32 403.4288, %v1451_v31  ;;  %v647_v54 = vadd.f32 1.0, %v646_v29  ;;  %v664_v20 = vmul.f32 -0.5, %v2397_v56 }
  0xa4   :  { %v1455_v8 = vpop.eup %1454  ;;  %v2460_v60 = vmul.f32 0.6931472, %v1453_v62  ;;  %vm2465_vm11 = vcmp.lt.f32.partialorder %v649_v28, 0.0004427343  ;;  %1468 = vlog2.f32 %v670_v22  ;;  %v679_v5 = vadd.f32 1.0, %v2434_v42 }
  0xa5   :  { %v1457_v23 = vpop.eup %1456  ;;  %v2463_v39 = vmul.f32 403.4288, %v1455_v8  ;;  %v2473_v31 = vmul.f32 %v629_v36, %v2373_v40  ;;  %v658_v62 = vand.u32 2147483647, %v2395_v12  ;;  %v673_v29 = vmul.f32 -0.5, %v2409_v19 }
  0xa6   :  { %v1459_v47 = vpop.eup %1458  ;;  %v2470_v13 = vmul.f32 0.6931472, %v1457_v23  ;;  %v2478_v8 = vmul.f32 %v638_v49, %v2379_v58  ;;  %v656_v28 = vadd.f32 1.0, %v655_v61  ;;  %v667_v10 = vand.u32 2147483647, %v2397_v56 }
  0xa7   :  { %v1461_v26 = vpop.eup %1460  ;;  %v627_v41 = vmul.f32 0.6931472, %v1459_v47  ;;  %v2486_v23 = vmul.f32 %v647_v54, %v2387_v27  ;;  %v665_v40 = vadd.f32 1.0, %v664_v20  ;;  %v676_v36 = vand.u32 2147483647, %v2409_v19 }
  0xa8   :  { %v1463_v46 = vpop.eup %1462  ;;  %v636_v32 = vmul.f32 0.6931472, %v1461_v26  ;;  %1470 = vlog2.f32 %v679_v5  ;;  %v682_v58 = vmul.f32 -0.5, %v2434_v42  ;;  %v688_v47 = vadd.f32 1.0, %v2436_v11 }
  0xa9   :  { %v624_v49 = vsel %vm2428_vm8, %v2426_v16, %v2470_v13  ;;  %vm2495_vm12 = vcmp.lt.f32.partialorder %v658_v62, 0.0004427343  ;;  %v674_v27 = vadd.f32 1.0, %v673_v29  ;;  %v691_v54 = vmul.f32 -0.5, %v2436_v11 }
  0xaa   :  { %v1465_v20 = vpop.eup %1464  ;;  %v633_v5 = vsel %vm2439_vm9, %v2473_v31, %v627_v41  ;;  %v2504_v26 = vmul.f32 %v656_v28, %v2395_v12  ;;  %vm2506_vm13 = vcmp.lt.f32.partialorder %v667_v10, 0.0004427343  ;;  %v697_v16 = vadd.f32 1.0, %v2445_v57 }
  0xab   :  { %v1467_v2 = vpop.eup %1466  ;;  %v645_v13 = vmul.f32 0.6931472, %v1463_v46  ;;  %v2512_v62 = vmul.f32 %v665_v40, %v2397_v56  ;;  %vm2514_vm14 = vcmp.lt.f32.partialorder %v676_v36, 0.0004427343  ;;  %v685_v41 = vand.u32 2147483647, %v2434_v42 }
  0xac   :  { %v642_v10 = vsel %vm2453_vm10, %v2478_v8, %v636_v32  ;;  %v683_v12 = vadd.f32 1.0, %v682_v58  ;;  %1472 = vlog2.f32 %v688_v47  ;;  %v706_v59 = vadd.f32 1.0, %v2447_v17 }
  0xad   :  { %v654_v31 = vmul.f32 0.6931472, %v1465_v20  ;;  %v2524_v46 = vmul.f32 %v674_v27, %v2409_v19  ;;  %v692_v56 = vadd.f32 1.0, %v691_v54  ;;  %v700_v28 = vmul.f32 -0.5, %v2445_v57 }
  0xae   :  { %v1469_v40 = vpop.eup %1468  ;;  %v663_v36 = vmul.f32 0.6931472, %v1467_v2  ;;  %v694_v22 = vand.u32 2147483647, %v2436_v11  ;;  %1474 = vlog2.f32 %v697_v16  ;;  %v715_v44 = vadd.f32 1.0, %v2449_v15 }
  0xaf   :  { %v651_v32 = vsel %vm2465_vm11, %v2486_v23, %v645_v13  ;;  %vm2532_vm15 = vcmp.lt.f32.partialorder %v685_v41, 0.0004427343  ;;  %v709_v19 = vmul.f32 -0.5, %v2447_v17  ;;  %v718_v8 = vmul.f32 -0.5, %v2449_v15 }
  0xb0   :  { %v2539_v58 = vmul.f32 %v683_v12, %v2434_v42  ;;  %v703_v47 = vand.u32 2147483647, %v2445_v57  ;;  %1476 = vlog2.f32 %v706_v59  ;;  %v724_v27 = vadd.f32 1.0, %v2451_v0 }
  0xb1   :  { %v660_v48 = vsel %vm2495_vm12, %v2504_v26, %v654_v31  ;;  %v672_v23 = vmul.f32 0.6931472, %v1469_v40  ;;  %v2547_v54 = vmul.f32 %v692_v56, %v2436_v11  ;;  %v701_v20 = vadd.f32 1.0, %v700_v28 }
  0xb2   :  { %v1471_v16 = vpop.eup %1470  ;;  %v669_v42 = vsel %vm2506_vm13, %v2512_v62, %v663_v36  ;;  %vm2552_vm0 = vcmp.lt.f32.partialorder %v694_v22, 0.0004427343  ;;  %v712_v13 = vand.u32 2147483647, %v2447_v17  ;;  %1478 = vlog2.f32 %v715_v44 }
  0xb3   :  { %v733_v61 = vadd.f32 1.0, %v2458_v52  ;;  %v710_v26 = vadd.f32 1.0, %v709_v19  ;;  %v719_v41 = vadd.f32 1.0, %v718_v8  ;;  %v727_v11 = vmul.f32 -0.5, %v2451_v0 }
  0xb4   :  { %v753_v12 = vadd.f32 %v633_v5, %v529_v4  ;;  %vm2561_vm1 = vcmp.lt.f32.partialorder %v703_v47, 0.0004427343  ;;  %v721_v34 = vand.u32 2147483647, %v2449_v15  ;;  %1480 = vlog2.f32 %v724_v27 }
  0xb5   :  { %v742_v22 = vadd.f32 1.0, %v2463_v39  ;;  %v754_v44 = vadd.f32 %v642_v10, %v530_v35  ;;  %v678_v62 = vsel %vm2514_vm14, %v2524_v46, %v672_v23  ;;  %v681_v31 = vmul.f32 0.6931472, %v1471_v16 }
  0xb6   :  { %v702_v3 = vmul.f32 %v701_v20, %v2445_v57  ;;  %v730_v4 = vand.u32 2147483647, %v2451_v0  ;;  %v1473_v5 = vpop.eup %1472  ;;  %vm2574_vm2 = vcmp.lt.f32.partialorder %v712_v13, 0.0004427343  ;;  %1482 = vlog2.f32 %v733_v61 }
  0xb7   :  { %v2786_v28 = vsub.f32 -1.6120857, %v2326_v33  ;;  %v2787_v6 = vsel %vm2416_vm7, %v2414_v7, %v2460_v60  ;;  %v2788_v29 = vsub.f32 -1.6120857, %v2328_v24  ;;  %v2789_v57 = vsub.f32 -1.6120857, %v2338_v30 }
  0xb8   :  { %v711_v40 = vmul.f32 %v710_v26, %v2447_v17  ;;  %v2591_v36 = vmul.f32 %v719_v41, %v2449_v15  ;;  %v728_v19 = vadd.f32 1.0, %v727_v11  ;;  %v891_v8 = vmul.f32 0.0, %v753_v12  ;;  %v1475_v33 = vpop.eup %1474 }
  0xb9   :  { %v751_v35 = vadd.f32 %v2787_v6, %v2786_v28  ;;  %v752_v10 = vadd.f32 %v624_v49, %v2788_v29  ;;  %v755_v46 = vadd.f32 %v651_v32, %v2789_v57  ;;  %vm2593_vm3 = vcmp.lt.f32.partialorder %v721_v34, 0.0004427343 }
  0xba   :  { %1484 = vlog2.f32 %v742_v22  ;;  %v2792_v7 = vsub.f32 -1.6120857, %v2340_v37  ;;  %v892_v60 = vmul.f32 0.0, %v754_v44  ;;  %v687_v30 = vsel %vm2532_vm15, %v2539_v58, %v681_v31  ;;  %v1477_v32 = vpop.eup %1476 }
  0xbb   :  { %v690_v17 = vmul.f32 0.6931472, %v1473_v5  ;;  %v736_v15 = vmul.f32 -0.5, %v2458_v52  ;;  %v739_v49 = vand.u32 2147483647, %v2458_v52  ;;  %v893_v37 = vmul.f32 0.0, %v755_v46 }
  0xbc   :  { %v756_v24 = vadd.f32 %v660_v48, %v2792_v7  ;;  %vm2604_vm5 = vcmp.lt.f32.partialorder %v730_v4, 0.0004427343  ;;  %v2795_v27 = vsub.f32 -1.6120857, %v2342_v25  ;;  %v960_v48 = vsel %vm355_vm4, %v751_v35, 0.0  ;;  %v1479_v61 = vpop.eup %1478 }
  0xbd   :  { %v961_v20 = vsel %vm355_vm4, %v752_v10, 0.0  ;;  %v699_v50 = vmul.f32 0.6931472, %v1475_v33  ;;  %v729_v58 = vmul.f32 %v728_v19, %v2451_v0  ;;  %v963_v13 = vsel %vm355_vm4, %v891_v8, 0.0 }
  0xbe   :  { %v757_v23 = vadd.f32 %v669_v42, %v2795_v27  ;;  %v962_v16 = vadd.f32 %v961_v20, %v960_v48  ;;  %v745_v26 = vmul.f32 -0.5, %v2463_v39  ;;  %v2796_v41 = vsub.f32 -1.6120857, %v2344_v9  ;;  %v1481_v0 = vpop.eup %1480 }
  0xbf   :  { %v894_v12 = vmul.f32 0.0, %v756_v24  ;;  %v965_v25 = vsel %vm355_vm4, %v892_v60, 0.0  ;;  %v696_v42 = vsel %vm2552_vm0, %v2547_v54, %v690_v17  ;;  %v708_v34 = vmul.f32 0.6931472, %v1477_v32 }
  0xc0   :  { %v758_v11 = vadd.f32 %v678_v62, %v2796_v41  ;;  %v737_v22 = vadd.f32 1.0, %v736_v15  ;;  %v964_v44 = vadd.f32 %v963_v13, %v962_v16  ;;  %v748_v31 = vand.u32 2147483647, %v2463_v39  ;;  %v1483_v2 = vpop.eup %1482 }
  0xc1   :  { %v2797_v4 = vsub.f32 -1.6120857, %v2348_v55  ;;  %v895_v28 = vmul.f32 0.0, %v757_v23  ;;  %v967_v9 = vsel %vm355_vm4, %v893_v37, 0.0  ;;  %v705_v62 = vsel %vm2561_vm1, %v702_v3, %v699_v50 }
  0xc2   :  { %v717_v6 = vmul.f32 0.6931472, %v1479_v61  ;;  %vm2627_vm7 = vcmp.lt.f32.partialorder %v739_v49, 0.0004427343  ;;  %v966_v54 = vadd.f32 %v965_v25, %v964_v44  ;;  %v746_v29 = vadd.f32 1.0, %v745_v26 }
  0xc3   :  { %v759_v5 = vadd.f32 %v687_v30, %v2797_v4  ;;  %v2800_v10 = vsub.f32 -1.6120857, %v2350_v38  ;;  %v896_v46 = vmul.f32 0.0, %v758_v11  ;;  %v969_v55 = vsel %vm355_vm4, %v894_v12, 0.0 }
  0xc4   :  { %v714_v19 = vsel %vm2574_vm2, %v711_v40, %v708_v34  ;;  %v726_v8 = vmul.f32 0.6931472, %v1481_v0  ;;  %v968_v59 = vadd.f32 %v967_v9, %v966_v54  ;;  %v770_v3 = vmul.f32 -81376.9, %v2423_v53  ;;  %v1485_v33 = vpop.eup %1484 }
  0xc5   :  { %v760_v57 = vadd.f32 %v696_v42, %v2800_v10  ;;  %v738_v7 = vmul.f32 %v737_v22, %v2458_v52  ;;  %v2801_v24 = vsub.f32 -1.6120857, %v2352_v43  ;;  %v897_v30 = vmul.f32 0.0, %v759_v5 }
  0xc6   :  { %v971_v38 = vsel %vm355_vm4, %v895_v28, 0.0  ;;  %v723_v17 = vsel %vm2593_vm3, %v2591_v36, %v717_v6  ;;  %v735_v15 = vmul.f32 0.6931472, %v1483_v2  ;;  %v970_v56 = vadd.f32 %v969_v55, %v968_v59 }
  0xc7   :  { %v761_v60 = vadd.f32 %v705_v62, %v2801_v24  ;;  %v771_v40 = vmul.f32 1.442695, %v770_v3  ;;  %v747_v49 = vmul.f32 %v746_v29, %v2463_v39  ;;  %v2802_v32 = vsub.f32 -1.6120857, %v2354_v18 }
  0xc8   :  { %v898_v23 = vmul.f32 0.0, %v760_v57  ;;  %v973_v52 = vsel %vm355_vm4, %v896_v46, 0.0  ;;  %v732_v43 = vsel %vm2604_vm5, %v729_v58, %v726_v8  ;;  %v744_v37 = vmul.f32 0.6931472, %v1485_v33 }
  0xc9   :  { %v762_v27 = vadd.f32 %v714_v19, %v2802_v32  ;;  %v972_v48 = vadd.f32 %v971_v38, %v970_v56  ;;  %1486 = vpow2.f32 %v771_v40  ;;  %vm2650_vm8 = vcmp.lt.f32.partialorder %v748_v31, 0.0004427343 }
  0xca   :  { %v2805_v36 = vsub.f32 -1.6120857, %v2357_v14  ;;  %v899_v39 = vmul.f32 0.0, %v761_v60  ;;  %v975_v18 = vsel %vm355_vm4, %v897_v30, 0.0  ;;  %v741_v50 = vsel %vm2627_vm7, %v738_v7, %v735_v15 }
  0xcb   :  { %v974_v16 = vadd.f32 %v973_v52, %v972_v48  ;;  %v542_v47 = vsub.f32 -1.6120857, %v2407_v21  ;;  %v2806_v58 = vsub.f32 -1.6120857, %v2359_v45  ;;  %v900_v61 = vmul.f32 0.0, %v762_v27 }
  0xcc   :  { %v763_v20 = vadd.f32 %v723_v17, %v2805_v36  ;;  %v977_v26 = vsel %vm355_vm4, %v898_v23, 0.0  ;;  %v750_v41 = vsel %vm2650_vm8, %v747_v49, %v744_v37  ;;  %v2807_v11 = vsub.f32 -1.6120857, %v2361_v51 }
  0xcd   :  { %v764_v13 = vadd.f32 %v732_v43, %v2806_v58  ;;  %v976_v14 = vadd.f32 %v975_v18, %v974_v16  ;;  %v979_v42 = vsel %vm355_vm4, %v899_v39, 0.0  ;;  %v766_v22 = vadd.f32 %v750_v41, %v542_v47 }
  0xce   :  { %v765_v12 = vadd.f32 %v741_v50, %v2807_v11  ;;  %v901_v25 = vmul.f32 0.0, %v763_v20  ;;  %v981_v21 = vsel %vm355_vm4, %v900_v61, 0.0  ;;  %v768_v55 = vmul.f32 0.5, %v2423_v53 }
  0xcf   :  { %v978_v34 = vadd.f32 %v977_v26, %v976_v14  ;;  %v902_v44 = vmul.f32 0.0, %v764_v13  ;;  %v904_v28 = vmul.f32 0.0, %v766_v22 }
  0xd0   :  { %v903_v0 = vmul.f32 0.0, %v765_v12  ;;  %v983_v31 = vsel %vm355_vm4, %v901_v25, 0.0  ;;  %v769_v3 = vsub.f32 -1.6120857, %v768_v55 }
  0xd1   :  { %v980_v45 = vadd.f32 %v979_v42, %v978_v34  ;;  %v985_v9 = vsel %vm355_vm4, %v902_v44, 0.0  ;;  %v989_v2 = vsel %vm355_vm4, %v904_v28, 0.0 }
  0xd2   :  { %v987_v6 = vsel %vm355_vm4, %v903_v0, 0.0 }
  0xd3   :  { %v1487_v4 = vpop.eup %1486  ;;  %v982_v5 = vadd.f32 %v981_v21, %v980_v45 }
  0xd4   :  { %v773_v62 = vmul.f32 403.4288, %v1487_v4 }
  0xd5   :  { %v984_v51 = vadd.f32 %v983_v31, %v982_v5 }
  0xd6   :  { %v774_v35 = vadd.f32 1.0, %v773_v62  ;;  %v777_v10 = vmul.f32 -0.5, %v773_v62  ;;  %v780_v19 = vand.u32 2147483647, %v773_v62 }
  0xd7   :  { %v986_v54 = vadd.f32 %v985_v9, %v984_v51 }
  0xd8   :  { %1488 = vlog2.f32 %v774_v35  ;;  %v778_v46 = vadd.f32 1.0, %v777_v10  ;;  %vm781_vm9 = vcmp.lt.f32.partialorder %v780_v19, 0.0004427343 }
  0xd9   :  { %v988_v29 = vadd.f32 %v987_v6, %v986_v54 }
  0xda   :  { %v779_v8 = vmul.f32 %v778_v46, %v773_v62 }
  0xdb   :  { %v990_v57 = vadd.f32 %v989_v2, %v988_v29 }
  0xdd   :  { %991 = vadd.xlane.f32.xlu1 %v990_v57 }
  0xe2   :  { %v1489_v59 = vpop.eup %1488 }
  0xe3   :  { %v776_v33 = vmul.f32 0.6931472, %v1489_v59 }
  0xe5   :  { %v782_v7 = vsel %vm781_vm9, %v779_v8, %v776_v33 }
  0xe6   :  { %v783_v24 = vadd.f32 %v782_v7, %v769_v3 }
  0xe8   :  { %v906_v60 = vmul.f32 %v2293_v63, %v783_v24  ;;  %v1204_v63 = vld [vmem:[#allocation3] ss:$0 sm:$0xff] }
  0xea   :  { %v1000_v30 = vsel %vm947_vm6, %v906_v60, 0.0 }
  0xeb   :  { %1001 = vadd.xlane.f32.xlu1 %v1000_v30 }
 0x10d   :  { %v939_v38 = vpop.xlane.xlu0 %938 }
 0x10e   :  { %v940_v17 = vrot.slane %v939_v38, 4 }
 0x110   :  { %v941_v15 = vadd.f32 %v940_v17, %v939_v38 }
 0x112   :  { %v942_v56 = vrot.slane %v941_v15, 2 }
 0x114   :  { %v943_v40 = vadd.f32 %v942_v56, %v941_v15 }
 0x116   :  { %v944_v49 = vrot.slane %v943_v40, 1 }
 0x118   :  { %v945_v53 = vadd.f32 %v944_v49, %v943_v40 }
 0x11a   :  { %1306 = vpush %v945_v53 }
 0x12d   :  { %v950_v32 = vpop.xlane.xlu0 %949 }
 0x12e   :  { %v951_v27 = vrot.slane %v950_v32, 4 }
 0x130   :  { %v952_v23 = vadd.f32 %v951_v27, %v950_v32 }
 0x132   :  { %v953_v52 = vrot.slane %v952_v23, 2 }
 0x134   :  { %v954_v43 = vadd.f32 %v953_v52, %v952_v23 }
 0x136   :  { %v955_v37 = vrot.slane %v954_v43, 1 }
 0x138   :  { %v956_v48 = vadd.f32 %v955_v37, %v954_v43 }
 0x13a   :  { %1308 = vpush %v956_v48 }
 0x14d   :  { %v1157_v1 = vpop.f32.mrb[0].mxu0 }
 0x14e   :  { %v1158_v36 = vadd.f32 %v1204_v63, %v1157_v1  ;;  %v1273_v20 = vpop.f32.mrb[1].mxu0 }
 0x150   :  { %1161 = vst [vmem:[#allocation4] sm:$0xff] %v1158_v36 }
 0x151   :  { %1501 = shalt.err (!%p1498_p4)
}
 0x152   :  { %s1502_s26 = scalar_lea.hbm %s2719_s7, 128 }
 0x153   :  { %p1503_p5 = scmp.ne.s32.totalorder %s2719_s7, %s1502_s26  ;;  %p1506_p6 = scmp.lt.u32.totalorder %s1502_s26, %s2719_s7 }
 0x155   :  { %p1508_p7 = pnand %p1506_p6, %p1503_p5 }
 0x157   :  { %1511 = shalt.err (!%p1508_p7)
}
 0x158   :  { %1171 = dma.vmem_to_hbm [thread:$0]  %s1169_s22, 128, %s2719_s7, [#allocation5]  }
 0x159   :  { %s1307_s12 = spop %1306  ;;  %s1564_s15 = smov [#allocation6]  }
 0x15a   :  { %s1178_s16 = sshll.u32 %s1564_s15, 4  ;;  %s1565_s17 = smov [#allocation8]   ;;  %s1179_s16 = int_to_ptr.vmem [resolvable:$true] %s1178_s16 }
 0x15b   :  { %s1188_s1 = sshll.u32 %s1565_s17, 4  ;;  %s1512_s5 = scalar_lea.vmem %s1179_s16, 128  ;;  %s1189_s1 = int_to_ptr.vmem [resolvable:$true] %s1188_s1 }
 0x15c   :  { %p1513_p8 = scmp.ne.s32.totalorder %s1179_s16, %s1512_s5  ;;  %p1517_p9 = scmp.lt.s32.totalorder %s1179_s16, %s1179_s16 }
 0x15d   :  { %p1518_p10 = scmp.lt.s32.totalorder %s1512_s5, %s1512_s5 }
 0x15f   :  { %p1519_p11 = por %p1518_p10, %p1517_p9 }
 0x161   :  { %p1520_p12 = pnand %p1519_p11, %p1513_p8 }
 0x16a   :  { %v992_v39 = vpop.xlane.xlu1 %991 }
 0x16b   :  { %s1309_s13 = spop %1308  ;;  %v993_v18 = vrot.slane %v992_v39, 4 }
 0x16c   :  { %s958_s2 = sadd.f32 %s1309_s13, %s1307_s12 }
 0x16d   :  { %v994_v50 = vadd.f32 %v993_v18, %v992_v39 }
 0x16e   :  { %s959_s14 = ssub.f32 0.0, %s958_s2 }
 0x16f   :  { %v995_v47 = vrot.slane %v994_v50, 2 }
 0x170   :  { %v1013_v16 = vstv %s959_s14 }
 0x171   :  { %1014 = vst [vmem:[#allocation8] sm:$0xff] %v1013_v16  ;;  %v996_v58 = vadd.f32 %v995_v47, %v994_v50 }
 0x173   :  { %v997_v13 = vrot.slane %v996_v58, 1 }
 0x175   :  { %v998_v61 = vadd.f32 %v997_v13, %v996_v58 }
 0x177   :  { %1310 = vpush %v998_v61 }
 0x178   :  { %v1002_v26 = vpop.xlane.xlu1 %1001 }
 0x179   :  { %v1003_v41 = vrot.slane %v1002_v26, 4 }
 0x17b   :  { %v1004_v14 = vadd.f32 %v1003_v41, %v1002_v26 }
 0x17d   :  { %v1005_v11 = vrot.slane %v1004_v14, 2 }
 0x17f   :  { %v1006_v12 = vadd.f32 %v1005_v11, %v1004_v14 }
 0x181   :  { %v1007_v25 = vrot.slane %v1006_v12, 1 }
 0x183   :  { %v1008_v42 = vadd.f32 %v1007_v25, %v1006_v12 }
 0x185   :  { %1312 = vpush %v1008_v42 }
 0x1a8   :  { %s1311_s7 = spop %1310 }
 0x1b6   :  { %s1313_s3 = spop %1312 }
 0x1b7   :  { %s1010_s18 = sadd.f32 %s1313_s3, %s1311_s7 }
 0x1b9   :  { %v1011_v34 = vstv %s1010_s18 }
 0x1ba   :  { %1012 = vst [vmem:[#allocation6] sm:$0xff] %v1011_v34 }
 0x1bb   :  { %1523 = shalt.err (!%p1520_p12)
}
 0x1bc   :  { %s1524_s20 = scalar_lea.hbm %s2720_s8, 128 }
 0x1bd   :  { %p1525_p13 = scmp.ne.s32.totalorder %s2720_s8, %s1524_s20  ;;  %p1528_p0 = scmp.lt.u32.totalorder %s1524_s20, %s2720_s8 }
 0x1bf   :  { %p1530_p1 = pnand %p1528_p0, %p1525_p13 }
 0x1c1   :  { %1533 = shalt.err (!%p1530_p1)
}
 0x1c2   :  { %1181 = dma.vmem_to_hbm [thread:$0]  %s1179_s16, 128, %s2720_s8, [#allocation7]  }
 0x1c3   :  { %s1534_s25 = scalar_lea.vmem %s1189_s1, 128  ;;  %p1539_p3 = scmp.lt.s32.totalorder %s1189_s1, %s1189_s1 }
 0x1c4   :  { %p1535_p2 = scmp.ne.s32.totalorder %s1189_s1, %s1534_s25  ;;  %p1540_p4 = scmp.lt.s32.totalorder %s1534_s25, %s1534_s25 }
 0x1c6   :  { %p1541_p5 = por %p1540_p4, %p1539_p3 }
 0x1c8   :  { %p1542_p6 = pnand %p1541_p5, %p1535_p2 }
 0x1ca   :  { %1545 = shalt.err (!%p1542_p6)
}
 0x1cb   :  { %s1546_s28 = scalar_lea.hbm %s2721_s9, 128 }
 0x1cc   :  { %p1547_p7 = scmp.ne.s32.totalorder %s2721_s9, %s1546_s28  ;;  %p1550_p8 = scmp.lt.u32.totalorder %s1546_s28, %s2721_s9 }
 0x1ce   :  { %p1552_p9 = pnand %p1550_p8, %p1547_p7 }
 0x1d0   :  { %1555 = shalt.err (!%p1552_p9)
}
 0x1d1   :  { %1191 = dma.vmem_to_hbm [thread:$0]  %s1189_s1, 128, %s2721_s9, [#allocation7]  }
 0x1d2   :  { %1556 = dma.done.wait [#allocation5], 128  }
 0x1d3   :  { %1557 = vsyncadd [#allocation5], 4294967168 }
 0x1d4   :  { %1558 = dma.done.wait [#allocation7], 256  }
 0x1d5   :  { %1559 = vsyncadd [#allocation7], 4294967040 }
 0x1d6   :  { %1201 = vsyncpa [#allocation5], 1 }
 0x1d7   :  { %1202 = vsyncpa [#allocation7], 1 }

</bundles_post_ra>
